<compile_context>
chip_gen: v5e
topology: v5e:2x2
jax: 0.10.0
libtpu: 0.0.40
codegen_flags: <defaults>
</compile_context>

<pallas_src>
import math

import jax
import jax.numpy as jnp
from jax.experimental import pallas as pl
from jax.experimental.pallas import tpu as pltpu


def _round_up(x, m):
    return ((x + m - 1) // m) * m


def _vmem_budget_bytes():
    """Usable VMEM request: chip capacity minus ~16 MiB Mosaic headroom.

    Falls back to a v7x-safe 64 MiB capacity if the query is unavailable, so a
    config that compiles here also fits the smallest-VMEM generation.
    """
    cap = 64 * 1024 * 1024
    try:
        cap = int(pltpu.get_tpu_info().vmem_capacity_bytes)
    except Exception:
        pass
    return max(cap - 16 * 1024 * 1024, 32 * 1024 * 1024)


def _silu_gate(fused, th):
    gate = fused[:, :th]          # lane-aligned slice (th % 128 == 0)
    up = fused[:, th:]
    # TODO(synk): if a bundle dump shows the VALU slot saturated, form sigmoid as
    # pl.reciprocal(1 + jnp.exp(-gate), approx=True) to push the divide onto the EUP.
    return up * (gate * jax.nn.sigmoid(gate))


def _glu_kernel_acc(x_ref, wf_ref, wd_ref, o_ref, acc_ref):
    # Variant with f32 accumulator scratch (used when the output dtype is not f32).
    # x_ref:   (tm, D_in)      already in the compute dtype (cast once in wrapper)
    # wf_ref:  (D_in, 2*th)    packed [gate_tile | up_tile] columns for H-tile k
    # wd_ref:  (th, tn)        down-projection slab for (H-tile k, D_out-tile j)
    # o_ref:   (tm, tn)        output tile (resident across the reduction axis)
    # acc_ref: (tm, tn) f32    accumulator scratch
    k = pl.program_id(2)

    @pl.when(k == 0)
    def _init():
        acc_ref[...] = jnp.zeros_like(acc_ref)

    th = wd_ref.shape[0]
    fused = jnp.dot(x_ref[...], wf_ref[...], preferred_element_type=jnp.float32)
    gated = _silu_gate(fused, th)
    acc_ref[...] += jnp.dot(gated.astype(wd_ref.dtype), wd_ref[...],
                            preferred_element_type=jnp.float32)

    @pl.when(k == pl.num_programs(2) - 1)
    def _finalize():
        o_ref[...] = acc_ref[...].astype(o_ref.dtype)


def _glu_kernel_f32out(x_ref, wf_ref, wd_ref, o_ref):
    # Variant for f32 outputs: accumulate directly into the resident output block
    # (saves tm*tn*4 bytes of VMEM and the finalize copy).
    k = pl.program_id(2)

    @pl.when(k == 0)
    def _init():
        o_ref[...] = jnp.zeros_like(o_ref)

    th = wd_ref.shape[0]
    fused = jnp.dot(x_ref[...], wf_ref[...], preferred_element_type=jnp.float32)
    gated = _silu_gate(fused, th)
    o_ref[...] += jnp.dot(gated.astype(wd_ref.dtype), wd_ref[...],
                          preferred_element_type=jnp.float32)


def prepare_params(w_fused, w_down, *, th=None, compute_dtype=jnp.bfloat16):
    """One-time weight repacking (transpose + pad + per-H-tile [gate|up] packing).

    w_fused: (2*H, D_in)  -- PyTorch fused_gate_up_proj.weight layout
    w_down:  (D_out, H)   -- PyTorch down_proj.weight layout
    th:      reduction (H) tile; None -> auto-sized from the chip's VMEM budget
    compute_dtype: MXU operand dtype (bf16 default; accumulation stays f32)
    """
    two_h, d_in = w_fused.shape
    h = two_h // 2
    d_out = w_down.shape[0]

    d_out_p = _round_up(d_out, 128)             # padded (lane-dense) output dim
    hp128 = _round_up(h, 128)
    itemsize = jnp.dtype(compute_dtype).itemsize

    if th is None:
        # Size th so both double-buffered streamed weight slabs
        # (wf: (D_in, 2*th), wd: (th, D_out_p)) stay under ~60% of the VMEM budget.
        per_th_bytes = 2 * itemsize * (2 * d_in + d_out_p)
        th = int(0.6 * _vmem_budget_bytes()) // max(per_th_bytes, 1)
        th = (th // 128) * 128
        th = max(128, min(th, 1024, hp128))
    else:
        th = max(128, min(_round_up(th, 128), hp128))
    hp = _round_up(hp128, th)                   # padded intermediate dim
    n_k = hp // th

    w_gate = jnp.pad(w_fused[:h, :].T, ((0, 0), (0, hp - h)))   # (D_in, Hp)
    w_up = jnp.pad(w_fused[h:, :].T, ((0, 0), (0, hp - h)))     # (D_in, Hp)
    # Per-tile interleave so each grid step reads one contiguous (D_in, 2*th) slab
    # laid out as [gate_tile_k | up_tile_k].
    wf = jnp.stack([w_gate.reshape(d_in, n_k, th),
                    w_up.reshape(d_in, n_k, th)], axis=2).reshape(d_in, 2 * hp)

    wd = jnp.pad(w_down.T, ((0, hp - h), (0, d_out_p - d_out)))  # (Hp, D_out_p)

    wf = wf.astype(compute_dtype)
    wd = wd.astype(compute_dtype)

    return {"w_fused_packed": wf, "w_down_packed": wd,
            "d_in": d_in, "h": h, "hp": hp, "th": th,
            "d_out": d_out, "d_out_p": d_out_p}


def glu_forward(x, params, *, tm=128, tn=None, buffer_count=None):
    """x: (..., D_in); params: output of prepare_params.

    tn: optional D_out tile (128-multiple dividing the padded D_out). Splitting
        D_out adds a second "parallel" grid axis — use on v7x for decode-shaped
        (single M-tile) calls so both TensorCores get work. Leave None on
        single-TC chips (splitting re-streams the gate/up slab per split).
    buffer_count: optional prefetch depth (>2) for the streamed weight slabs;
        useful on VMEM-rich v5e/v6e for small-M (decode) shapes.
    """
    orig_shape = x.shape
    d_in = params["d_in"]
    assert orig_shape[-1] == d_in, "last dim of x must equal input_dim"
    hp, th = params["hp"], params["th"]
    d_out, d_out_p = params["d_out"], params["d_out_p"]
    wf, wd = params["w_fused_packed"], params["w_down_packed"]

    out_dtype = x.dtype
    # Cast ONCE in the wrapper (x is constant across the reduction axis).
    xm = x.reshape(-1, d_in).astype(wf.dtype)
    m = xm.shape[0]
    m_pad = _round_up(max(m, 1), tm)
    if m_pad != m:
        xm = jnp.pad(xm, ((0, m_pad - m), (0, 0)))

    if tn is None:
        tn = d_out_p
    assert tn % 128 == 0 and d_out_p % tn == 0, \
        "tn must be a 128-multiple divisor of the padded output dim"

    n_i, n_j, n_k = m_pad // tm, d_out_p // tn, hp // th
    grid = (n_i, n_j, n_k)

    w_size = jnp.dtype(wf.dtype).itemsize
    out_size = jnp.dtype(out_dtype).itemsize

    # f32 outputs accumulate directly into the resident output block.
    use_scratch = jnp.dtype(out_dtype) != jnp.dtype(jnp.float32)
    kernel = _glu_kernel_acc if use_scratch else _glu_kernel_f32out
    scratch_shapes = [pltpu.VMEM((tm, tn), jnp.float32)] if use_scratch else []

    def _wspec(shape, index_map):
        if buffer_count is None or buffer_count <= 2:
            return pl.BlockSpec(shape, index_map)
        return pl.BlockSpec(shape, index_map,
                            pipeline_mode=pl.Buffered(buffer_count))

    # Advisory cost: weights are re-streamed per M tile; wf additionally per D_out split.
    flops = 2 * m_pad * d_in * 2 * hp * n_j + 2 * m_pad * hp * d_out_p
    bytes_accessed = (m_pad * d_in * w_size
                      + n_i * n_j * wf.size * w_size
                      + n_i * wd.size * w_size
                      + m_pad * d_out_p * out_size)
    cost = pl.CostEstimate(flops=int(flops),
                           transcendentals=int(m_pad * hp * n_j),
                           bytes_accessed=int(bytes_accessed))

    # VMEM request: buffered tiles (+ scratch) with ~25% slack, capped by the
    # per-chip budget (capacity - headroom) so v7x's 64 MiB is never oversubscribed.
    nbuf = 2 if buffer_count is None else max(2, buffer_count)
    tile_bytes = (2 * tm * d_in * w_size
                  + nbuf * d_in * 2 * th * w_size
                  + nbuf * th * tn * w_size
                  + 2 * tm * tn * out_size
                  + (tm * tn * 4 if use_scratch else 0))
    vmem_limit = int(min(_vmem_budget_bytes(),
                         max(32 * 1024 * 1024, int(1.25 * tile_bytes))))

    out = pl.pallas_call(
        kernel,
        out_shape=jax.ShapeDtypeStruct((m_pad, d_out_p), out_dtype),
        grid_spec=pltpu.PrefetchScalarGridSpec(
            num_scalar_prefetch=0,
            grid=grid,
            in_specs=[
                pl.BlockSpec((tm, d_in), lambda i, j, k: (i, 0)),
                _wspec((d_in, 2 * th), lambda i, j, k: (0, k)),
                _wspec((th, tn), lambda i, j, k: (k, j)),
            ],
            out_specs=pl.BlockSpec((tm, tn), lambda i, j, k: (i, j)),
            scratch_shapes=scratch_shapes,
        ),
        compiler_params=pltpu.CompilerParams(
            dimension_semantics=("parallel", "parallel", "arbitrary"),
            vmem_limit_bytes=vmem_limit),
        cost_estimate=cost,
    )(xm, wf, wd)

    out = out[:m, :d_out]
    return out.reshape(*orig_shape[:-1], d_out)


def init_params(key, input_dim, intermediate_dim, output_dim, dtype=jnp.float32):
    k1, k2 = jax.random.split(key)
    # fused_gate_up_proj: xavier_uniform with gain sqrt(2.0), shape (2*H, D_in)
    fan_in, fan_out = input_dim, 2 * intermediate_dim
    bound = math.sqrt(2.0) * math.sqrt(6.0 / (fan_in + fan_out))
    w_fused = jax.random.uniform(k1, (2 * intermediate_dim, input_dim),
                                 minval=-bound, maxval=bound, dtype=dtype)
    # down_proj: PyTorch default nn.Linear init (kaiming uniform)
    bound_d = 1.0 / math.sqrt(intermediate_dim)
    w_down = jax.random.uniform(k2, (output_dim, intermediate_dim),
                                minval=-bound_d, maxval=bound_d, dtype=dtype)
    return w_fused, w_down


def glu_reference(x, w_fused, w_down):
    h = w_fused.shape[0] // 2
    fused = x @ w_fused.T
    gate, up = fused[..., :h], fused[..., h:]
    gated = up * jax.nn.silu(gate)
    return gated @ w_down.T


if __name__ == "__main__":
    # Dims exercise all paths: M (16) padded to tm=128; H (320) padded to 512 and
    # split into two 256-wide reduction tiles; D_out (192) padded to 256.
    batch, seq = 2, 8
    input_dim, intermediate_dim, output_dim = 256, 320, 192

    key = jax.random.PRNGKey(0)
    kx, kp = jax.random.split(key)
    x = jax.random.normal(kx, (batch, seq, input_dim), dtype=jnp.float32)
    w_fused, w_down = init_params(kp, input_dim, intermediate_dim, output_dim)
    ref = glu_reference(x, w_fused, w_down)

    # 1) Default bf16 compute path; th=256 forces a 2-step reduction, tn=128
    #    exercises the D_out split used to feed v7x's second TensorCore on decode.
    params_bf16 = prepare_params(w_fused, w_down, th=256)      # compute_dtype=bf16
    out_bf16 = jax.block_until_ready(glu_forward(x, params_bf16, tm=128, tn=128))
    assert out_bf16.shape == (batch, seq, output_dim)
    assert jnp.allclose(out_bf16, ref, atol=5e-2, rtol=5e-2), "bf16 path mismatch"

    # 2) f32 compute path with auto tile selection (direct-accumulate-into-output
    #    variant) — tight numerical check against the reference.
    params_f32 = prepare_params(w_fused, w_down, compute_dtype=jnp.float32)
    out_f32 = jax.block_until_ready(glu_forward(x, params_f32, tm=128))
    assert out_f32.shape == (batch, seq, output_dim)
    assert jnp.allclose(out_f32, ref, atol=1e-4, rtol=1e-4), "f32 path mismatch"

    # 3) bf16 activations/outputs -> exercises the f32 accumulator-scratch variant.
    out_b = jax.block_until_ready(glu_forward(x.astype(jnp.bfloat16), params_bf16))
    assert out_b.dtype == jnp.bfloat16 and out_b.shape == (batch, seq, output_dim)
    assert jnp.allclose(out_b.astype(jnp.float32), ref, atol=8e-2, rtol=8e-2), \
        "bf16-output path mismatch"

    print("KERNEL_OK")
</pallas_src>

<mosaic_0001>
module attributes {stable_mosaic.version = 11 : i64} {
  func.func @_glu_kernel_f32out(%arg0: i32, %arg1: i32, %arg2: i32, %arg3: memref<128x256xbf16, #tpu.memory_space<vmem>>, %arg4: memref<256x512xbf16, #tpu.memory_space<vmem>>, %arg5: memref<256x128xbf16, #tpu.memory_space<vmem>>, %arg6: memref<128x128xf32, #tpu.memory_space<vmem>>) attributes {dimension_semantics = [#tpu.dimension_semantics<parallel>, #tpu.dimension_semantics<parallel>, #tpu.dimension_semantics<arbitrary>], iteration_bounds = array<i64: 1, 2, 2>, scalar_prefetch = 0 : i64, scratch_operands = 0 : i64, tpu.core_type = #tpu.core_type<tc>, window_params = [{transform_indices = @transform_0, window_bounds = array<i64: 128, 256>}, {transform_indices = @transform_1, window_bounds = array<i64: 256, 512>}, {transform_indices = @transform_2, window_bounds = array<i64: 256, 128>}, {transform_indices = @transform_3, window_bounds = array<i64: 128, 128>}]} {
    %c0_i32 = arith.constant 0 : i32
    %0 = arith.cmpi eq, %arg2, %c0_i32 : i32
    %1 = arith.extui %0 : i1 to i32
    %c0_i32_0 = arith.constant 0 : i32
    %2 = arith.cmpi ne, %1, %c0_i32_0 : i32
    scf.if %2 {
      %cst_12 = arith.constant 0.000000e+00 : f32
      %21 = vector.broadcast %cst_12 : f32 to vector<128x128xf32>
      %c0_13 = arith.constant 0 : index
      %c0_14 = arith.constant 0 : index
      %22 = vector.load %arg6[%c0_13, %c0_14] : memref<128x128xf32, #tpu.memory_space<vmem>>, vector<128x128xf32>
      tpu.vector_store %arg6[%c0_13, %c0_14], %21 {strides = array<i32>} : memref<128x128xf32, #tpu.memory_space<vmem>>, vector<128x128xf32>,
    } else {
    }
    %c0 = arith.constant 0 : index
    %c0_1 = arith.constant 0 : index
    %3 = vector.load %arg3[%c0, %c0_1] : memref<128x256xbf16, #tpu.memory_space<vmem>>, vector<128x256xbf16>
    %c0_2 = arith.constant 0 : index
    %c0_3 = arith.constant 0 : index
    %4 = vector.load %arg4[%c0_2, %c0_3] : memref<256x512xbf16, #tpu.memory_space<vmem>>, vector<256x512xbf16>
    %cst = arith.constant dense<0.000000e+00> : vector<128x512xf32>
    %5 = tpu.matmul %3, %4, %cst {dimension_numbers = #tpu.dot_dimension_numbers<[1], [0], [0], [1], [0, 0, 1, 1], [], []>} : vector<128x256xbf16>, vector<256x512xbf16>, vector<128x512xf32> -> vector<128x512xf32>
    %6 = vector.extract_strided_slice %5 {offsets = [0, 0], sizes = [128, 256], strides = [1, 1]} : vector<128x512xf32> to vector<128x256xf32>
    %7 = vector.extract_strided_slice %5 {offsets = [0, 256], sizes = [128, 256], strides = [1, 1]} : vector<128x512xf32> to vector<128x256xf32>
    %8 = arith.negf %6 : vector<128x256xf32>
    %9 = math.exp %8 : vector<128x256xf32>
    %cst_4 = arith.constant 1.000000e+00 : f32
    %10 = vector.broadcast %cst_4 : f32 to vector<128x256xf32>
    %11 = arith.addf %10, %9 : vector<128x256xf32>
    %12 = arith.divf %10, %11 : vector<128x256xf32>
    %13 = arith.mulf %6, %12 : vector<128x256xf32>
    %14 = arith.mulf %7, %13 : vector<128x256xf32>
    %c0_5 = arith.constant 0 : index
    %c0_6 = arith.constant 0 : index
    %15 = vector.load %arg6[%c0_5, %c0_6] : memref<128x128xf32, #tpu.memory_space<vmem>>, vector<128x128xf32>
    %16 = arith.truncf %14 : vector<128x256xf32> to vector<128x256xbf16>
    %c0_7 = arith.constant 0 : index
    %c0_8 = arith.constant 0 : index
    %17 = vector.load %arg5[%c0_7, %c0_8] : memref<256x128xbf16, #tpu.memory_space<vmem>>, vector<256x128xbf16>
    %cst_9 = arith.constant dense<0.000000e+00> : vector<128x128xf32>
    %18 = tpu.matmul %16, %17, %cst_9 {dimension_numbers = #tpu.dot_dimension_numbers<[1], [0], [0], [1], [0, 0, 1, 1], [], []>} : vector<128x256xbf16>, vector<256x128xbf16>, vector<128x128xf32> -> vector<128x128xf32>
    %19 = arith.addf %15, %18 : vector<128x128xf32>
    %c0_10 = arith.constant 0 : index
    %c0_11 = arith.constant 0 : index
    %20 = vector.load %arg6[%c0_10, %c0_11] : memref<128x128xf32, #tpu.memory_space<vmem>>, vector<128x128xf32>
    tpu.vector_store %arg6[%c0_10, %c0_11], %19 {strides = array<i32>} : memref<128x128xf32, #tpu.memory_space<vmem>>, vector<128x128xf32>,
    return
  }
  func.func @transform_0(%arg0: i32, %arg1: i32, %arg2: i32) -> (i32, i32) {
    %c0_i32 = arith.constant 0 : i32
    %c0_i32_0 = arith.constant 0 : i32
    return %arg0, %c0_i32 : i32, i32
  }
  func.func @transform_1(%arg0: i32, %arg1: i32, %arg2: i32) -> (i32, i32) {
    %c0_i32 = arith.constant 0 : i32
    %c0_i32_0 = arith.constant 0 : i32
    return %c0_i32, %arg2 : i32, i32
  }
  func.func @transform_2(%arg0: i32, %arg1: i32, %arg2: i32) -> (i32, i32) {
    %c0_i32 = arith.constant 0 : i32
    return %arg2, %arg1 : i32, i32
  }
  func.func @transform_3(%arg0: i32, %arg1: i32, %arg2: i32) -> (i32, i32) {
    %c0_i32 = arith.constant 0 : i32
    return %arg0, %arg1 : i32, i32
  }
}

</mosaic_0001>

<bundles_post_ra>
// kernel: tpu_custom_call.1
= control target key start
LH: loop header
LB: loop body
LE: loop exit
PB: predicated region body
PF: predicated region fallthrough
CT: control target
= control target key end

     0   :  { %s4684_s0 = inlined_call_operand.hbm [shape: bf16[128,256], index: 0, kind: input, shape index: {}]   ;;  %s4685_s1 = inlined_call_operand.hbm [shape: bf16[256,1024], index: 1, kind: input, shape index: {}]   ;;  %s4686_s2 = inlined_call_operand.hbm [shape: bf16[512,256], index: 2, kind: input, shape index: {}]   ;;  %s4687_s3 = inlined_call_operand.hbm [shape: f32[128,256], index: 3, kind: output, shape index: {}]  }
   0x1   :  { %4699 = sst [smem:[#allocation23_spill]] %s4684_s0 }
   0x2   :  { %4700 = sst [smem:[#allocation24_spill]] %s4685_s1 }
   0x3   :  { %4701 = sst [smem:[#allocation25_spill]] %s4687_s3 }
   0x4   :  { %8 = vsyncpa [#allocation3], 0 }
   0x5   :  { %9 = vsyncpa [#allocation6], 0 }
   0x6   :  { %11 = vsyncpa [#allocation6 + $0x1], 0 }
   0x7   :  { %12 = vsyncpa [#allocation4], 0 }
   0x8   :  { %14 = vsyncpa [#allocation4 + $0x1], 0  ;;  %s3393_s12 = smov 0   ;;  %s3395_s13 = smov 0  }
   0x9   :  { %s3397_s14 = smov 0   ;;  %s3399_s15 = smov 0  }
   0xa   :  { %s3401_s16 = smov 0   ;;  %s3403_s17 = smov 0  }
   0xb   :  { %s3405_s18 = smov 0   ;;  %s3407_s19 = smov 0  }
   0xc   :  { %s3409_s20 = smov 0   ;;  %s3411_s21 = smov 0  }
   0xd   :  { %s3413_s22 = smov 0   ;;  %s3415_s23 = smov 0  }
   0xe   :  { %s3417_s24 = smov 0   ;;  %s3419_s25 = smov 0  }
   0xf LB: > { %4702 = sst [smem:[#allocation13_spill]] %s3307_s12  ;;  %s32_s26 = sadd.s32 1, %s3351_s23  ;;  %s3359_s25 = sphi %s3419_s25, %s20_s25   ;;  %s3355_s24 = sphi %s3417_s24, %s4784_s24   ;;  %s3351_s23 = sphi %s3415_s23, %s4774_s23   ;;  %s3347_s22 = sphi %s3413_s22, %s4783_s22   ;;  %s3343_s21 = sphi %s3411_s21, %s4773_s21   ;;  %s3339_s20 = sphi %s3409_s20, %s4772_s20   ;;  %s3335_s19 = sphi %s3407_s19, %s4782_s19   ;;  %s3331_s18 = sphi %s3405_s18, %s4781_s18   ;;  %s3327_s17 = sphi %s3403_s17, %s4780_s17   ;;  %s3323_s16 = sphi %s3401_s16, %s4779_s16   ;;  %s3319_s15 = sphi %s3399_s15, %s4778_s15   ;;  %s3315_s14 = sphi %s3397_s14, %s4777_s14   ;;  %s3311_s13 = sphi %s3395_s13, %s4776_s13   ;;  %s3307_s12 = sphi %s3393_s12, %s4775_s12  }
  0x10   : > { %4703 = sst [smem:[#allocation14_spill]] %s3311_s13  ;;  %s72_s27 = sadd.s32 1, %s3339_s20 }
  0x11   : > { %4704 = sst [smem:[#allocation15_spill]] %s3339_s20  ;;  %p3465_p0 = scmp.ge.s32.totalorder %s32_s26, 2 }
  0x12   : > { %4705 = sst [smem:[#allocation16_spill]] %s3343_s21  ;;  %p79_p1 = scmp.ne.s32.totalorder %s3339_s20, %s3335_s19 }
  0x13   : > { %4706 = sst [smem:[#allocation17_spill]] %s3347_s22  ;;  %p80_p2 = scmp.eq.s32.totalorder %s3359_s25, 0 }
  0x14   : > { %4707 = sst [smem:[#allocation18_spill]] %s3351_s23  ;;  %p85_p3 = scmp.ne.s32.totalorder %s3335_s19, %s3331_s18 }
  0x15   : > { %s4786_s26 = smov (%p3465_p0, %s32_s26), 0  ;;  %p3480_p4 = por %p80_p2, %p79_p1 }
  0x16   : > { %4709 = sst [smem:[#allocation19_spill]] %s4786_s26  ;;  %s3486_s30 = ssub.s32 %s3351_s23, %s4786_s26 }
  0x17   : > { %p2860_p5 = scmp.lt.s32.totalorder %s3359_s25, 4  ;;  %p70_p6 = scmp.eq.s32.totalorder %s3486_s30, 0 }
  0x18   : > { %s183_s4 = sand.u32 1, %s3359_s25   ;;  %s185_s5 = sand.u32 1, %s3339_s20  }
  0x19   : > { %s3493_s6 = scalar_select %p70_p6, %s3339_s20, %s72_s27  }
  0x1a   : > { %s2287_s7 = sshll.u32 %s185_s5, 9  ;;  %s2720_s8 = sshll.u32 %s3351_s23, 4 }
  0x1b   : > { %4711 = sst [smem:[#allocation20_spill]] %s3493_s6  ;;  %s187_s3 = scalar_lea.vmem [#allocation5], %s2287_s7 }
  0x1c   : > { %s4712_s1 = sld [smem:[#allocation24_spill]]  ;;  %s195_s22 = sshll.u32 %s187_s3, 4  ;;  %s196_s22 = int_to_ptr.vmem [resolvable:$true] %s195_s22 }
  0x1d   : > { %p2849_p7 = pnand %p2860_p5, %p3480_p4  ;;  %s3503_s27 = scalar_lea.sflag [#allocation6], %s183_s4 }
  0x1e   : > { %s3361_s5 = smov 512   ;;  %s3363_s9 = smov 16  }
  0x1f   : > { %s3507_s7 = sadd.s32 4294967295, %s3359_s25   ;;  %s2283_s3 = sadd.s32 4294967294, %s3359_s25  }
  0x20   : > { %p86_p8 = scmp.eq.s32.totalorder %s3507_s7, 0  ;;  %p113_p9 = scmp.ne.s32.totalorder %s3323_s16, %s3319_s15 }
  0x21   : > { %p138_p11 = scmp.ne.s32.totalorder %s3315_s14, %s3311_s13  ;;  %p139_p13 = scmp.eq.s32.totalorder %s3507_s7, 3 }
  0x22   : > { %s192_s11 = scalar_lea.hbm %s4712_s1, %s2720_s8  ;;  %s3362_s8 = smov 256  }
  0x23   : > { %s193_s26 = sshll.u32 %s192_s11, 4  ;;  %p3519_p10 = por %p86_p8, %p85_p3  ;;  %s194_s26 = int_to_ptr.hbm [resolvable:$true] %s193_s26 }
  0x24   : > { %2851 = dma.hbm_to_vmem [thread:$0]  (!%p2849_p7), %s194_s26, 8192, %s196_s22, %s3503_s27, %s3361_s5, %s3362_s8, %s3363_s9  }
  0x25   : > { %p3527_p12 = por %p113_p9, %p86_p8  ;;  %p144_p1 = scmp.ne.s32.totalorder %s3311_s13, %s3307_s12 }
  0x26   : > { %p145_p4 = scmp.eq.s32.totalorder %s2283_s3, 3  ;;  %p3534_p6 = por %p139_p13, %p138_p11 }
  0x27   : > { %p2284_p3 = scmp.ge.s32.totalorder %s3359_s25, 1  ;;  %p152_p9 = scmp.lt.s32.totalorder %s3359_s25, 5 }
  0x28   : > { %s4715_s15 = scalar_select %p3534_p6, 1, 0 }
  0x29   : > { %p3539_p7 = por %p145_p4, %p144_p1  ;;  %s4719_s0 = sld [smem:[#allocation23_spill]] }
  0x2a   : > { %4716 = sst [smem:[#allocation21_spill]] %s4715_s15  ;;  %p3547_p11 = pnand %p2284_p3, %p152_p9 }
  0x2b   : > { %s4717_s18 = scalar_select %p3539_p7, 1, 0 }
  0x2c   : > { %p2844_p13 = pneg %p3547_p11  ;;  %s3364_s8 = smov [#allocation2]  }
  0x2d   : > { %4718 = sst [smem:[#allocation22_spill]] %s4717_s18  ;;  %s169_s9 = sshll.u32 %s3364_s8, 4  ;;  %s170_s9 = int_to_ptr.vmem [resolvable:$true] %s169_s9 }
  0x2e   : > { %p2845_p1 = pnand %p2844_p13, %p86_p8  ;;  %s4690_s3 = smov 128  }
  0x2f   : > { %s167_s11 = sshll.u32 %s4719_s0, 4  ;;  %s3366_s26 = smov 8   ;;  %s168_s11 = int_to_ptr.hbm [resolvable:$true] %s167_s11 }
  0x30   : > { %2847 = dma.hbm_to_vmem [thread:$0]  (!%p2845_p1), %s168_s11, 2048, %s170_s9, [#allocation3], %s4690_s3, %s4690_s3, %s3366_s26  }
  0x31   : > { %s35_s10 = sadd.s32 1, %s3355_s24  ;;  %s100_s29 = sadd.s32 1, %s3327_s17 }
  0x32   : > { %s4788_s10 = smov (!%p3465_p0, %s35_s10), %s3355_s24  ;;  %p107_p4 = scmp.ne.s32.totalorder %s3327_s17, %s3323_s16 }
  0x33   : > { %s207_s8 = sand.u32 1, %s3327_s17   ;;  %p37_p3 = scmp.ge.s32.totalorder %s4788_s10, 2 }
  0x34   : > { %s2290_s0 = sshll.u32 %s207_s8, 7  ;;  %p3567_p9 = por %p107_p4, %p80_p2 }
  0x35   : > { %s4790_s10 = smov (%p37_p3, %s4788_s10), 0  ;;  %s2721_s11 = sshll.u32 %s3351_s23, 6 }
  0x36   : > { %s209_s28 = scalar_lea.vmem [#allocation7], %s2290_s0  ;;  %s96_s26 = ssub.s32 %s3355_s24, %s4790_s10 }
  0x37   : > { %s219_s9 = sshll.u32 %s209_s28, 4  ;;  %s214_s3 = sadd.s32 %s3355_s24, %s2721_s11  ;;  %s220_s9 = int_to_ptr.vmem [resolvable:$true] %s219_s9 }
  0x38   : > { %s97_s6 = sor.u32 %s96_s26, %s3486_s30  ;;  %p126_p0 = scmp.eq.s32.totalorder %s96_s26, 0 }
  0x39   : > { %p98_p13 = scmp.eq.s32.totalorder %s97_s6, 0  ;;  %s2293_s8 = sshll.u32 %s214_s3, 2 }
  0x3a   : > { %s4722_s20 = sadd.s32 1, %s3315_s14  ;;  %s216_s13 = scalar_lea.hbm %s4686_s2, %s2293_s8 }
  0x3b   : > { %s3581_s18 = scalar_select %p126_p0, %s3315_s14, %s4722_s20  }
  0x3c   : > { %s3584_s12 = scalar_select %p98_p13, %s3327_s17, %s100_s29  }
  0x3d   : > { %s217_s23 = sshll.u32 %s216_s13, 4  ;;  %p2852_p2 = pnand %p2860_p5, %p3567_p9  ;;  %s218_s23 = int_to_ptr.hbm [resolvable:$true] %s217_s23 }
  0x3e   : > { %s3367_s0 = smov 64   ;;  %s3368_s30 = smov 4  }
  0x3f   : > { %s4723_s11 = smov 128   ;;  %231 = sbr.rel (%p3547_p11) target bundleno = 738 (0x2e2), region = 32 }
  0x40   : > { %2854 = dma.hbm_to_vmem [thread:$0]  (!%p2852_p2), %s218_s23, 2048, %s220_s9, %s3503_s27, %s4723_s11, %s3367_s0, %s3368_s30  }
  0x44   : > { %3290 = dma.done.wait (%p86_p8), [#allocation3], 2048  }
  0x45   : > { %3292 = vsyncadd (%p86_p8), [#allocation3], 4294965248  ;;  %s238_s1 = sand.u32 1, %s3507_s7   ;;  %s240_s13 = sand.u32 1, %s3335_s19  }
  0x46   : > { %s2296_s20 = sshll.u32 %s240_s13, 9  ;;  %s239_s21 = scalar_lea.sflag [#allocation6], %s238_s1 }
  0x47   : > { %s3603_s6 = scalar_lea.vmem [#allocation5], %s2296_s20 }
  0x48   : > { %3294 = dma.done.wait (%p3519_p10), %s239_s21, 8192  }
  0x49   : > { %3296 = vsyncadd (%p3519_p10), %s239_s21, 4294959104  ;;  %s250_s23 = sand.u32 1, %s3323_s16  }
  0x4a   : > { %s2297_s27 = sshll.u32 %s250_s23, 7 }
  0x4b   : > { %s3610_s29 = scalar_lea.vmem [#allocation7], %s2297_s27 }
  0x4c   : > { %3298 = dma.done.wait (%p3527_p12), %s239_s21, 2048  }
  0x4d   : > { %3300 = vsyncadd (%p3527_p12), %s239_s21, 4294965248  ;;  %s4724_s7 = sld [smem:[#allocation14_spill]] }
  0x4e   : > { %s4725_s4 = sld [smem:[#allocation16_spill]] }
  0x53   : > { %s278_s15 = sand.u32 1, %s4724_s7  }
  0x54   : > { %s2298_s5 = sshll.u32 %s278_s15, 7  ;;  %p2299_p5 = scmp.ne.s32.totalorder %s4725_s4, 0 }
  0x55   : > { %s3619_s3 = scalar_lea.vmem [#allocation8], %s2298_s5 }
  0x56   : > { %288 = sbr.rel (%p2299_p5) target bundleno = 108 (0x6c), region = 48 }
  0x5b   : > { %v3369_v0 = vmov 0.0  }
  0x5c   : > { %289 = vst [vmem:[%s3619_s3] sm:$0xff] %v3369_v0 }
  0x5d   : > { %290 = vst [vmem:[%s3619_s3 + $0x8] sm:$0xff] %v3369_v0 }
  0x5e   : > { %291 = vst [vmem:[%s3619_s3 + $0x10] sm:$0xff] %v3369_v0 }
  0x5f   : > { %292 = vst [vmem:[%s3619_s3 + $0x18] sm:$0xff] %v3369_v0 }
  0x60   : > { %293 = vst [vmem:[%s3619_s3 + $0x20] sm:$0xff] %v3369_v0 }
  0x61   : > { %294 = vst [vmem:[%s3619_s3 + $0x28] sm:$0xff] %v3369_v0 }
  0x62   : > { %295 = vst [vmem:[%s3619_s3 + $0x30] sm:$0xff] %v3369_v0 }
  0x63   : > { %296 = vst [vmem:[%s3619_s3 + $0x38] sm:$0xff] %v3369_v0 }
  0x64   : > { %297 = vst [vmem:[%s3619_s3 + $0x40] sm:$0xff] %v3369_v0 }
  0x65   : > { %298 = vst [vmem:[%s3619_s3 + $0x48] sm:$0xff] %v3369_v0 }
  0x66   : > { %299 = vst [vmem:[%s3619_s3 + $0x50] sm:$0xff] %v3369_v0 }
  0x67   : > { %300 = vst [vmem:[%s3619_s3 + $0x58] sm:$0xff] %v3369_v0 }
  0x68   : > { %301 = vst [vmem:[%s3619_s3 + $0x60] sm:$0xff] %v3369_v0 }
  0x69   : > { %302 = vst [vmem:[%s3619_s3 + $0x68] sm:$0xff] %v3369_v0 }
  0x6a   : > { %303 = vst [vmem:[%s3619_s3 + $0x70] sm:$0xff] %v3369_v0 }
  0x6b   : > { %304 = vst [vmem:[%s3619_s3 + $0x78] sm:$0xff] %v3369_v0 }
  0x6c PF: > { %v2478_v1 = vld [vmem:[%s3603_s6 + $0xe0] sm:$0xf]  ;;  %v2768_v2 = vld [vmem:[%s3603_s6 + $0xec] sm:$0xf0]  ;;  %v2723_v48 = vld [vmem:[#allocation2 + $0x4] sm:$0xf0] }
  0x6d   : > { %v2606_v3 = vld [vmem:[%s3603_s6 + $0x1e0] sm:$0xf]  ;;  %v2479_v4 = vor.u32 %v2768_v2, %v2478_v1  ;;  %v2800_v5 = vld [vmem:[%s3603_s6 + $0x1ec] sm:$0xf0]  ;;  %v2766_v49 = vld [vmem:[%s3603_s6 + $0xe4] sm:$0xf] }
  0x6e   : > { %v2462_v6 = vld [vmem:[%s3603_s6 + $0xc0] sm:$0xf]  ;;  %v2764_v7 = vld [vmem:[%s3603_s6 + $0xcc] sm:$0xf0]  ;;  %v2607_v8 = vor.u32 %v2800_v5, %v2606_v3  ;;  %v2480_v50 = vld [vmem:[%s3603_s6 + $0xf0] sm:$0xf0] }
  0x6f   : > { %v2590_v9 = vld [vmem:[%s3603_s6 + $0x1c0] sm:$0xf]  ;;  %v2796_v10 = vld [vmem:[%s3603_s6 + $0x1cc] sm:$0xf0]  ;;  %785 = vmatpush.bf16.msra.mxu0 %v2479_v4  ;;  %2818 = vmatpush.bf16.msra.mxu2 %v2479_v4  ;;  %v2463_v11 = vor.u32 %v2764_v7, %v2462_v6  ;;  %v2798_v51 = vld [vmem:[%s3603_s6 + $0x1e4] sm:$0xf]  ;;  %v2483_v61 = vor.u32 %v2766_v49, %v2480_v50 }
  0x70   : > { %834 = vmatpush.bf16.msra.mxu1 %v2607_v8  ;;  %2826 = vmatpush.bf16.msra.mxu3 %v2607_v8  ;;  %v2591_v12 = vor.u32 %v2796_v10, %v2590_v9  ;;  %v2446_v13 = vld [vmem:[%s3603_s6 + $0xa0] sm:$0xf]  ;;  %v2760_v14 = vld [vmem:[%s3603_s6 + $0xac] sm:$0xf0]  ;;  %v2608_v52 = vld [vmem:[%s3603_s6 + $0x1f0] sm:$0xf0] }
  0x71   : > { %v2574_v15 = vld [vmem:[%s3603_s6 + $0x1a0] sm:$0xf]  ;;  %v2792_v16 = vld [vmem:[%s3603_s6 + $0x1ac] sm:$0xf0]  ;;  %v2447_v17 = vor.u32 %v2760_v14, %v2446_v13  ;;  %v2731_v55 = vld [vmem:[#allocation2 + $0x44] sm:$0xf0]  ;;  %v2611_v62 = vor.u32 %v2798_v51, %v2608_v52 }
  0x72   : > { %v2575_v18 = vor.u32 %v2792_v16, %v2574_v15  ;;  %v2430_v19 = vld [vmem:[%s3603_s6 + $0x80] sm:$0xf]  ;;  %v2756_v20 = vld [vmem:[%s3603_s6 + $0x8c] sm:$0xf0]  ;;  %v2722_v56 = vld [vmem:[#allocation2 + $0x4] sm:$0xf] }
  0x73   : > { %786 = vmatpush.bf16.msra.mxu0 %v2463_v11  ;;  %2819 = vmatpush.bf16.msra.mxu2 %v2463_v11  ;;  %v2558_v21 = vld [vmem:[%s3603_s6 + $0x180] sm:$0xf]  ;;  %v2788_v22 = vld [vmem:[%s3603_s6 + $0x18c] sm:$0xf0]  ;;  %v2431_v23 = vor.u32 %v2756_v20, %v2430_v19  ;;  %v2304_v58 = vld [vmem:[#allocation2 + $0x8] sm:$0xf0] }
  0x74   : > { %835 = vmatpush.bf16.msra.mxu1 %v2591_v12  ;;  %2827 = vmatpush.bf16.msra.mxu3 %v2591_v12  ;;  %v2559_v24 = vor.u32 %v2788_v22, %v2558_v21  ;;  %v2414_v25 = vld [vmem:[%s3603_s6 + $0x60] sm:$0xf]  ;;  %v2752_v26 = vld [vmem:[%s3603_s6 + $0x6c] sm:$0xf0]  ;;  %v2730_v59 = vld [vmem:[#allocation2 + $0x44] sm:$0xf]  ;;  %v3682_v5 = vor.u32 %v2722_v56, %v2304_v58 }
  0x75   : > { %v2542_v27 = vld [vmem:[%s3603_s6 + $0x160] sm:$0xf]  ;;  %v2784_v28 = vld [vmem:[%s3603_s6 + $0x16c] sm:$0xf0]  ;;  %v2415_v29 = vor.u32 %v2752_v26, %v2414_v25  ;;  %v2336_v60 = vld [vmem:[#allocation2 + $0x48] sm:$0xf0] }
  0x76   : > { %v2543_v30 = vor.u32 %v2784_v28, %v2542_v27  ;;  %v2398_v31 = vld [vmem:[%s3603_s6 + $0x40] sm:$0xf]  ;;  %v2748_v32 = vld [vmem:[%s3603_s6 + $0x4c] sm:$0xf0]  ;;  %v2762_v63 = vld [vmem:[%s3603_s6 + $0xc4] sm:$0xf]  ;;  %v3684_v6 = vor.u32 %v2730_v59, %v2336_v60 }
  0x77   : > { %787 = vmatpush.bf16.msra.mxu0 %v2447_v17  ;;  %2820 = vmatpush.bf16.msra.mxu2 %v2447_v17  ;;  %v2526_v33 = vld [vmem:[%s3603_s6 + $0x140] sm:$0xf]  ;;  %v2780_v34 = vld [vmem:[%s3603_s6 + $0x14c] sm:$0xf0]  ;;  %v2399_v35 = vor.u32 %v2748_v32, %v2398_v31  ;;  %v2464_v2 = vld [vmem:[%s3603_s6 + $0xd0] sm:$0xf0] }
  0x78   : > { %836 = vmatpush.bf16.msra.mxu1 %v2575_v18  ;;  %2828 = vmatpush.bf16.msra.mxu3 %v2575_v18  ;;  %v2527_v36 = vor.u32 %v2780_v34, %v2526_v33  ;;  %v2382_v37 = vld [vmem:[%s3603_s6 + $0x20] sm:$0xf]  ;;  %v2744_v38 = vld [vmem:[%s3603_s6 + $0x2c] sm:$0xf0]  ;;  %v2794_v3 = vld [vmem:[%s3603_s6 + $0x1c4] sm:$0xf]  ;;  %v2467_v8 = vor.u32 %v2762_v63, %v2464_v2 }
  0x79   : > { %v2510_v39 = vld [vmem:[%s3603_s6 + $0x120] sm:$0xf]  ;;  %v2776_v40 = vld [vmem:[%s3603_s6 + $0x12c] sm:$0xf0]  ;;  %v2383_v41 = vor.u32 %v2744_v38, %v2382_v37  ;;  %v2592_v4 = vld [vmem:[%s3603_s6 + $0x1d0] sm:$0xf0] }
  0x7a   : > { %v2366_v42 = vld [vmem:[%s3603_s6] sm:$0xf]  ;;  %v2511_v43 = vor.u32 %v2776_v40, %v2510_v39  ;;  %v2740_v44 = vld [vmem:[%s3603_s6 + $0xc] sm:$0xf0]  ;;  %v2758_v7 = vld [vmem:[%s3603_s6 + $0xa4] sm:$0xf]  ;;  %v2595_v9 = vor.u32 %v2794_v3, %v2592_v4 }
  0x7b   : > { %788 = vmatpush.bf16.msra.mxu0 %v2431_v23  ;;  %2821 = vmatpush.bf16.msra.mxu2 %v2431_v23  ;;  %v2494_v45 = vld [vmem:[%s3603_s6 + $0x100] sm:$0xf]  ;;  %v2772_v46 = vld [vmem:[%s3603_s6 + $0x10c] sm:$0xf0]  ;;  %v2367_v53 = vor.u32 %v2740_v44, %v2366_v42  ;;  %v2448_v10 = vld [vmem:[%s3603_s6 + $0xb0] sm:$0xf0] }
  0x7c   : > { %837 = vmatpush.bf16.msra.mxu1 %v2559_v24  ;;  %2829 = vmatpush.bf16.msra.mxu3 %v2559_v24  ;;  %v2302_v47 = vld [vmem:[#allocation2] sm:$0xf]  ;;  %v2495_v57 = vor.u32 %v2772_v46, %v2494_v45  ;;  %v2790_v11 = vld [vmem:[%s3603_s6 + $0x1a4] sm:$0xf]  ;;  %v2576_v12 = vld [vmem:[%s3603_s6 + $0x1b0] sm:$0xf0]  ;;  %v2451_v20 = vor.u32 %v2758_v7, %v2448_v10 }
  0x7d   : > { %v2334_v54 = vld [vmem:[#allocation2 + $0x40] sm:$0xf]  ;;  %v3675_v0 = vor.u32 %v2723_v48, %v2302_v47  ;;  %v2486_v13 = vld [vmem:[%s3603_s6 + $0xe8] sm:$0xf]  ;;  %v2769_v14 = vld [vmem:[%s3603_s6 + $0xf4] sm:$0xf0]  ;;  %v2579_v21 = vor.u32 %v2790_v11, %v2576_v12 }
  0x7e   : > { %v3677_v1 = vor.u32 %v2731_v55, %v2334_v54  ;;  %v2614_v15 = vld [vmem:[%s3603_s6 + $0x1e8] sm:$0xf]  ;;  %v2487_v16 = vor.u32 %v2769_v14, %v2486_v13  ;;  %v2754_v17 = vld [vmem:[%s3603_s6 + $0x84] sm:$0xf]  ;;  %v2801_v18 = vld [vmem:[%s3603_s6 + $0x1f4] sm:$0xf0] }
  0x7f   : > { %789 = vmatpush.bf16.msra.mxu0 %v2415_v29  ;;  %2822 = vmatpush.bf16.msra.mxu2 %v2415_v29  ;;  %v2470_v19 = vld [vmem:[%s3603_s6 + $0xc8] sm:$0xf]  ;;  %v2615_v22 = vor.u32 %v2801_v18, %v2614_v15  ;;  %v2765_v23 = vld [vmem:[%s3603_s6 + $0xd4] sm:$0xf0]  ;;  %v2432_v26 = vld [vmem:[%s3603_s6 + $0x90] sm:$0xf0] }
  0x80   : > { %838 = vmatpush.bf16.msra.mxu1 %v2543_v30  ;;  %2830 = vmatpush.bf16.msra.mxu3 %v2543_v30  ;;  %v2598_v24 = vld [vmem:[%s3603_s6 + $0x1c8] sm:$0xf]  ;;  %v2797_v25 = vld [vmem:[%s3603_s6 + $0x1d4] sm:$0xf0]  ;;  %v2786_v27 = vld [vmem:[%s3603_s6 + $0x184] sm:$0xf]  ;;  %v2471_v29 = vor.u32 %v2765_v23, %v2470_v19  ;;  %v2435_v39 = vor.u32 %v2754_v17, %v2432_v26 }
  0x81   : > { %v2560_v28 = vld [vmem:[%s3603_s6 + $0x190] sm:$0xf0]  ;;  %v2599_v30 = vor.u32 %v2797_v25, %v2598_v24  ;;  %v2454_v31 = vld [vmem:[%s3603_s6 + $0xa8] sm:$0xf]  ;;  %v2761_v32 = vld [vmem:[%s3603_s6 + $0xb4] sm:$0xf0] }
  0x82   : > { %v2582_v33 = vld [vmem:[%s3603_s6 + $0x1a8] sm:$0xf]  ;;  %v2793_v34 = vld [vmem:[%s3603_s6 + $0x1b4] sm:$0xf0]  ;;  %v2342_v37 = vld [vmem:[#allocation2 + $0x50] sm:$0xf]  ;;  %v2563_v40 = vor.u32 %v2786_v27, %v2560_v28  ;;  %v2455_v45 = vor.u32 %v2761_v32, %v2454_v31 }
  0x83   : > { %790 = vmatpush.bf16.msra.mxu0 %v2399_v35  ;;  %2823 = vmatpush.bf16.msra.mxu2 %v2399_v35  ;;  %v2310_v35 = vld [vmem:[#allocation2 + $0x10] sm:$0xf]  ;;  %v2733_v38 = vld [vmem:[#allocation2 + $0x54] sm:$0xf0]  ;;  %v2416_v42 = vld [vmem:[%s3603_s6 + $0x70] sm:$0xf0]  ;;  %v2583_v49 = vor.u32 %v2793_v34, %v2582_v33 }
  0x84   : > { %839 = vmatpush.bf16.msra.mxu1 %v2527_v36  ;;  %2831 = vmatpush.bf16.msra.mxu3 %v2527_v36  ;;  %v2725_v36 = vld [vmem:[#allocation2 + $0x14] sm:$0xf0]  ;;  %v2544_v44 = vld [vmem:[%s3603_s6 + $0x170] sm:$0xf0]  ;;  %v2312_v47 = vld [vmem:[#allocation2 + $0x18] sm:$0xf0]  ;;  %v3721_v59 = vor.u32 %v2733_v38, %v2342_v37 }
  0x85   : > { %v2724_v46 = vld [vmem:[#allocation2 + $0x14] sm:$0xf]  ;;  %v2344_v50 = vld [vmem:[#allocation2 + $0x58] sm:$0xf0]  ;;  %v2746_v51 = vld [vmem:[%s3603_s6 + $0x44] sm:$0xf]  ;;  %v3719_v58 = vor.u32 %v2725_v36, %v2310_v35 }
  0x86   : > { %v2732_v48 = vld [vmem:[#allocation2 + $0x54] sm:$0xf]  ;;  %v2438_v52 = vld [vmem:[%s3603_s6 + $0x88] sm:$0xf]  ;;  %v2757_v55 = vld [vmem:[%s3603_s6 + $0x94] sm:$0xf0]  ;;  %v3726_v63 = vor.u32 %v2724_v46, %v2312_v47 }
  0x87   : > { %791 = vmatpush.bf16.msra.mxu0 %v2383_v41  ;;  %2824 = vmatpush.bf16.msra.mxu2 %v2383_v41  ;;  %v2750_v41 = vld [vmem:[%s3603_s6 + $0x64] sm:$0xf]  ;;  %v2566_v56 = vld [vmem:[%s3603_s6 + $0x188] sm:$0xf]  ;;  %v2400_v60 = vld [vmem:[%s3603_s6 + $0x50] sm:$0xf0]  ;;  %v3728_v2 = vor.u32 %v2732_v48, %v2344_v50  ;;  %v2439_v3 = vor.u32 %v2757_v55, %v2438_v52 }
  0x88   : > { %840 = vmatpush.bf16.msra.mxu1 %v2511_v43  ;;  %2832 = vmatpush.bf16.msra.mxu3 %v2511_v43  ;;  %v2782_v43 = vld [vmem:[%s3603_s6 + $0x164] sm:$0xf]  ;;  %v2403_v7 = vor.u32 %v2746_v51, %v2400_v60  ;;  %v2753_v10 = vld [vmem:[%s3603_s6 + $0x74] sm:$0xf0]  ;;  %v2550_v11 = vld [vmem:[%s3603_s6 + $0x168] sm:$0xf] }
  0x89   : > { %v2547_v54 = vor.u32 %v2782_v43, %v2544_v44  ;;  %v2742_v12 = vld [vmem:[%s3603_s6 + $0x24] sm:$0xf]  ;;  %v2384_v13 = vld [vmem:[%s3603_s6 + $0x30] sm:$0xf0]  ;;  %v2785_v17 = vld [vmem:[%s3603_s6 + $0x174] sm:$0xf0] }
  0x8a   : > { %v2774_v14 = vld [vmem:[%s3603_s6 + $0x124] sm:$0xf]  ;;  %v2512_v15 = vld [vmem:[%s3603_s6 + $0x130] sm:$0xf0]  ;;  %v2406_v18 = vld [vmem:[%s3603_s6 + $0x48] sm:$0xf]  ;;  %v2387_v19 = vor.u32 %v2742_v12, %v2384_v13 }
  0x8b   : > { %792 = vmatpush.bf16.msra.mxu0 %v2367_v53  ;;  %2825 = vmatpush.bf16.msra.mxu2 %v2367_v53  ;;  %v2419_v53 = vor.u32 %v2750_v41, %v2416_v42  ;;  %v2534_v23 = vld [vmem:[%s3603_s6 + $0x148] sm:$0xf]  ;;  %v2781_v24 = vld [vmem:[%s3603_s6 + $0x154] sm:$0xf0]  ;;  %v2738_v25 = vld [vmem:[%s3603_s6 + $0x4] sm:$0xf] }
  0x8c   : > { %841 = vmatpush.bf16.msra.mxu1 %v2495_v57  ;;  %2833 = vmatpush.bf16.msra.mxu3 %v2495_v57  ;;  %v2789_v57 = vld [vmem:[%s3603_s6 + $0x194] sm:$0xf0]  ;;  %v2368_v26 = vld [vmem:[%s3603_s6 + $0x10] sm:$0xf0]  ;;  %v2770_v27 = vld [vmem:[%s3603_s6 + $0x104] sm:$0xf] }
  0x8d   : > { %v2567_v4 = vor.u32 %v2789_v57, %v2566_v56  ;;  %v2496_v28 = vld [vmem:[%s3603_s6 + $0x110] sm:$0xf0]  ;;  %v2390_v31 = vld [vmem:[%s3603_s6 + $0x28] sm:$0xf]  ;;  %v2371_v32 = vor.u32 %v2738_v25, %v2368_v26  ;;  %v2745_v34 = vld [vmem:[%s3603_s6 + $0x34] sm:$0xf0] }
  0x8e   : > { %793 = vmatmul.bf16.vlgmr.msra.gmra.mxu0 %v3675_v0  ;;  %813 = vmatmul.bf16.vlgmr.msra.gmra.mxu2 %v3677_v1  ;;  %v2499_v33 = vor.u32 %v2770_v27, %v2496_v28  ;;  %v2518_v35 = vld [vmem:[%s3603_s6 + $0x128] sm:$0xf]  ;;  %v2777_v36 = vld [vmem:[%s3603_s6 + $0x134] sm:$0xf0]  ;;  %v2318_v37 = vld [vmem:[#allocation2 + $0x20] sm:$0xf] }
  0x8f   : > { %883 = vmatpush.bf16.msrb.mxu2 %v2483_v61  ;;  %842 = vmatmul.bf16.vlgmr.msra.gmra.mxu1 %v3682_v5  ;;  %v2778_v61 = vld [vmem:[%s3603_s6 + $0x144] sm:$0xf]  ;;  %v2727_v38 = vld [vmem:[#allocation2 + $0x24] sm:$0xf0]  ;;  %v2320_v42 = vld [vmem:[#allocation2 + $0x28] sm:$0xf0]  ;;  %v2519_v46 = vor.u32 %v2777_v36, %v2518_v35 }
  0x90   : > { %932 = vmatpush.bf16.msrb.mxu3 %v2611_v62  ;;  %981 = vmatpush.bf16.msrb.mxu0 %v2487_v16  ;;  %v2528_v62 = vld [vmem:[%s3603_s6 + $0x150] sm:$0xf0]  ;;  %v2726_v41 = vld [vmem:[#allocation2 + $0x24] sm:$0xf]  ;;  %v2352_v44 = vld [vmem:[#allocation2 + $0x68] sm:$0xf0]  ;;  %v3758_v51 = vor.u32 %v2727_v38, %v2318_v37 }
  0x91   : > { %862 = vmatmul.bf16.vlgmr.msra.gmra.mxu3 %v3684_v6  ;;  %1030 = vmatpush.bf16.msrb.mxu1 %v2615_v22  ;;  %v2749_v22 = vld [vmem:[%s3603_s6 + $0x54] sm:$0xf0]  ;;  %v2734_v43 = vld [vmem:[#allocation2 + $0x64] sm:$0xf]  ;;  %v2374_v47 = vld [vmem:[%s3603_s6 + $0x8] sm:$0xf] }
  0x92   : > { %v2741_v48 = vld [vmem:[%s3603_s6 + $0x14] sm:$0xf0]  ;;  %v2767_v57 = vld [vmem:[%s3603_s6 + $0xec] sm:$0xf]  ;;  %v2488_v60 = vld [vmem:[%s3603_s6 + $0xf8] sm:$0xf0] }
  0x93   : > { %884 = vmatpush.bf16.msrb.mxu2 %v2467_v8  ;;  %v2531_v8 = vor.u32 %v2778_v61, %v2528_v62  ;;  %v2773_v50 = vld [vmem:[%s3603_s6 + $0x114] sm:$0xf0]  ;;  %v2375_v55 = vor.u32 %v2741_v48, %v2374_v47  ;;  %v2799_v61 = vld [vmem:[%s3603_s6 + $0x1ec] sm:$0xf]  ;;  %v2491_v62 = vor.u32 %v2767_v57, %v2488_v60  ;;  %v2328_v12 = vld [vmem:[#allocation2 + $0x38] sm:$0xf0] }
  0x94   : > { %933 = vmatpush.bf16.msrb.mxu3 %v2595_v9  ;;  %982 = vmatpush.bf16.msrb.mxu0 %v2471_v29  ;;  %v2422_v9 = vld [vmem:[%s3603_s6 + $0x68] sm:$0xf]  ;;  %v2407_v29 = vor.u32 %v2749_v22, %v2406_v18  ;;  %v2736_v13 = vld [vmem:[#allocation2 + $0x74] sm:$0xf]  ;;  %v2759_v25 = vld [vmem:[%s3603_s6 + $0xac] sm:$0xf] }
  0x95   : > { %1031 = vmatpush.bf16.msrb.mxu1 %v2599_v30  ;;  %v2423_v16 = vor.u32 %v2753_v10, %v2422_v9  ;;  %v2535_v30 = vor.u32 %v2781_v24, %v2534_v23  ;;  %v2358_v9 = vld [vmem:[#allocation2 + $0x70] sm:$0xf]  ;;  %v2737_v10 = vld [vmem:[#allocation2 + $0x74] sm:$0xf0]  ;;  %v2600_v23 = vld [vmem:[%s3603_s6 + $0x1d8] sm:$0xf0] }
  0x96   : > { %v2456_v26 = vld [vmem:[%s3603_s6 + $0xb8] sm:$0xf0]  ;;  %v2791_v27 = vld [vmem:[%s3603_s6 + $0x1ac] sm:$0xf]  ;;  %s4762_s22 = sld [smem:[#allocation17_spill]]  ;;  %s2154_s1 = sshll.u32 %s3619_s3, 4  ;;  %s2155_s1 = int_to_ptr.vmem [resolvable:$true] %s2154_s1 }
  0x97   : > { %885 = vmatpush.bf16.msrb.mxu2 %v2451_v20  ;;  %v2515_v20 = vor.u32 %v2774_v14, %v2512_v15  ;;  %v2360_v14 = vld [vmem:[#allocation2 + $0x78] sm:$0xf0]  ;;  %v2459_v28 = vor.u32 %v2759_v25, %v2456_v26  ;;  %v2751_v38 = vld [vmem:[%s3603_s6 + $0x6c] sm:$0xf]  ;;  %s4764_s0 = sld [smem:[#allocation25_spill]]  ;;  %s2140_s20 = scalar_lea.sflag [#allocation4], %s278_s15 }
  0x98   : > { %934 = vmatpush.bf16.msrb.mxu3 %v2579_v21  ;;  %983 = vmatpush.bf16.msrb.mxu0 %v2455_v45  ;;  %v2551_v21 = vor.u32 %v2785_v17, %v2550_v11  ;;  %v2391_v45 = vor.u32 %v2745_v34, %v2390_v31  ;;  %v2728_v11 = vld [vmem:[#allocation2 + $0x34] sm:$0xf]  ;;  %v3780_v18 = vor.u32 %v2736_v13, %v2360_v14  ;;  %v2755_v31 = vld [vmem:[%s3603_s6 + $0x8c] sm:$0xf]  ;;  %v2568_v35 = vld [vmem:[%s3603_s6 + $0x198] sm:$0xf0] }
  0x99   : > { %1032 = vmatpush.bf16.msrb.mxu1 %v2583_v49  ;;  %v2502_v49 = vld [vmem:[%s3603_s6 + $0x108] sm:$0xf]  ;;  %v3778_v17 = vor.u32 %v2728_v11, %v2328_v12  ;;  %v2809_v11 = vld [vmem:[%s3610_s29 + $0x38] sm:$0xff] }
  0x9a   : > { %v2503_v56 = vor.u32 %v2773_v50, %v2502_v49  ;;  %v2807_v26 = vld [vmem:[%s3610_s29 + $0x28] sm:$0xff] }
  0x9b   : > { %886 = vmatpush.bf16.msrb.mxu2 %v2435_v39  ;;  %v2350_v39 = vld [vmem:[#allocation2 + $0x60] sm:$0xf] }
  0x9c   : > { %935 = vmatpush.bf16.msrb.mxu3 %v2563_v40  ;;  %984 = vmatpush.bf16.msrb.mxu0 %v2439_v3  ;;  %v2735_v40 = vld [vmem:[#allocation2 + $0x64] sm:$0xf0]  ;;  %v2616_v3 = vld [vmem:[%s3603_s6 + $0x1f8] sm:$0xf0]  ;;  %s2717_s9 = sshll.u32 %s4762_s22, 3 }
  0x9d   : > { %1033 = vmatpush.bf16.msrb.mxu1 %v2567_v4  ;;  %v3760_v52 = vor.u32 %v2735_v40, %v2350_v39  ;;  %v2619_v4 = vor.u32 %v2799_v61, %v2616_v3  ;;  %v2424_v39 = vld [vmem:[%s3603_s6 + $0x78] sm:$0xf0]  ;;  %v2783_v40 = vld [vmem:[%s3603_s6 + $0x16c] sm:$0xf]  ;;  %s2153_s30 = scalar_lea.hbm %s4764_s0, %s2717_s9 }
  0x9e   : > { %798 = vmatmul.bf16.gmra.mxu0 %v3719_v58  ;;  %818 = vmatmul.bf16.gmra.mxu2 %v3721_v59  ;;  %v2747_v61 = vld [vmem:[%s3603_s6 + $0x4c] sm:$0xf]  ;;  %s2156_s13 = sshll.u32 %s2153_s30, 4  ;;  %s2157_s13 = int_to_ptr.hbm [resolvable:$true] %s2156_s13 }
  0x9f   : > { %887 = vmatpush.bf16.msrb.mxu2 %v2419_v53  ;;  %847 = vmatmul.bf16.gmra.mxu1 %v3726_v63  ;;  %v3762_v53 = vor.u32 %v2726_v41, %v2320_v42  ;;  %v2427_v42 = vor.u32 %v2751_v38, %v2424_v39  ;;  %s3219_s21 = sshra.s32 %s2157_s13, 4  ;;  %s3220_s21 = int_to_ptr.hbm [resolvable:$true] %s3219_s21 }
  0xa0   : > { %936 = vmatpush.bf16.msrb.mxu3 %v2547_v54  ;;  %985 = vmatpush.bf16.msrb.mxu0 %v2423_v16  ;;  %v3764_v54 = vor.u32 %v2734_v43, %v2352_v44  ;;  %v3776_v16 = vor.u32 %v2737_v10, %v2358_v9  ;;  %v2552_v43 = vld [vmem:[%s3603_s6 + $0x178] sm:$0xf0]  ;;  %p3226_p11 = scmp.lt.s32.totalorder %s3220_s21, %s4764_s0 }
  0xa1   : > { %867 = vmatmul.bf16.gmra.mxu3 %v3728_v2  ;;  %1034 = vmatpush.bf16.msrb.mxu1 %v2551_v21  ;;  %v2795_v21 = vld [vmem:[%s3603_s6 + $0x1cc] sm:$0xf]  ;;  %v2555_v44 = vor.u32 %v2783_v40, %v2552_v43 }
  0xa2   : > { %v2603_v24 = vor.u32 %v2795_v21, %v2600_v23 }
  0xa3   : > { %888 = vmatpush.bf16.msrb.mxu2 %v2403_v7  ;;  %v2326_v7 = vld [vmem:[#allocation2 + $0x30] sm:$0xf] }
  0xa4   : > { %937 = vmatpush.bf16.msrb.mxu3 %v2531_v8  ;;  %986 = vmatpush.bf16.msrb.mxu0 %v2407_v29  ;;  %v2729_v8 = vld [vmem:[#allocation2 + $0x34] sm:$0xf0]  ;;  %v2584_v29 = vld [vmem:[%s3603_s6 + $0x1b8] sm:$0xf0] }
  0xa5   : > { %1035 = vmatpush.bf16.msrb.mxu1 %v2535_v30  ;;  %v3774_v15 = vor.u32 %v2729_v8, %v2326_v7  ;;  %v2587_v30 = vor.u32 %v2791_v27, %v2584_v29  ;;  %v2536_v7 = vld [vmem:[%s3603_s6 + $0x158] sm:$0xf0] }
  0xa6   : > { %v2392_v29 = vld [vmem:[%s3603_s6 + $0x38] sm:$0xf0] }
  0xa7   : > { %889 = vmatpush.bf16.msrb.mxu2 %v2387_v19  ;;  %v2763_v19 = vld [vmem:[%s3603_s6 + $0xcc] sm:$0xf] }
  0xa8   : > { %938 = vmatpush.bf16.msrb.mxu3 %v2515_v20  ;;  %987 = vmatpush.bf16.msrb.mxu0 %v2391_v45  ;;  %v2472_v20 = vld [vmem:[%s3603_s6 + $0xd8] sm:$0xf0] }
  0xa9   : > { %1036 = vmatpush.bf16.msrb.mxu1 %v2519_v46  ;;  %v2475_v22 = vor.u32 %v2763_v19, %v2472_v20 }
  0xab   : > { %890 = vmatpush.bf16.msrb.mxu2 %v2371_v32  ;;  %v2440_v32 = vld [vmem:[%s3603_s6 + $0x98] sm:$0xf0] }
  0xac   : > { %939 = vmatpush.bf16.msrb.mxu3 %v2499_v33  ;;  %988 = vmatpush.bf16.msrb.mxu0 %v2375_v55  ;;  %v2787_v33 = vld [vmem:[%s3603_s6 + $0x18c] sm:$0xf]  ;;  %v2443_v34 = vor.u32 %v2755_v31, %v2440_v32 }
  0xad   : > { %1037 = vmatpush.bf16.msrb.mxu1 %v2503_v56  ;;  %v2571_v36 = vor.u32 %v2787_v33, %v2568_v35  ;;  %v2775_v33 = vld [vmem:[%s3603_s6 + $0x12c] sm:$0xf]  ;;  %v2806_v35 = vld [vmem:[%s3610_s29 + $0x20] sm:$0xff] }
  0xae   : > { %803 = vmatmul.bf16.gmra.mxu0 %v3758_v51  ;;  %823 = vmatmul.bf16.gmra.mxu2 %v3760_v52 }
  0xaf   : > { %852 = vmatmul.bf16.gmra.mxu1 %v3762_v53  ;;  %1079 = vmatpush.bf16.msra.mxu2 %v2491_v62  ;;  %v2408_v62 = vld [vmem:[%s3603_s6 + $0x58] sm:$0xf0] }
  0xb0   : > { %1128 = vmatpush.bf16.msra.mxu3 %v2619_v4  ;;  %v2411_v3 = vor.u32 %v2747_v61, %v2408_v62  ;;  %v2779_v4 = vld [vmem:[%s3603_s6 + $0x14c] sm:$0xf]  ;;  %2009 = vmatpush.bf16.msra.mxu0 %v2809_v11  ;;  %v2376_v11 = vld [vmem:[%s3603_s6 + $0x18] sm:$0xf0] }
  0xb1   : > { %872 = vmatmul.bf16.gmra.mxu3 %v3764_v54  ;;  %v2539_v8 = vor.u32 %v2779_v4, %v2536_v7  ;;  %v2803_v62 = vld [vmem:[%s3610_s29 + $0x8] sm:$0xff] }
  0xb3   : > { %1080 = vmatpush.bf16.msra.mxu2 %v2475_v22  ;;  %v2808_v22 = vld [vmem:[%s3610_s29 + $0x30] sm:$0xff] }
  0xb4   : > { %1129 = vmatpush.bf16.msra.mxu3 %v2603_v24  ;;  %2010 = vmatpush.bf16.msra.mxu0 %v2808_v22 }
  0xb7   : > { %1081 = vmatpush.bf16.msra.mxu2 %v2459_v28  ;;  %v2743_v28 = vld [vmem:[%s3603_s6 + $0x2c] sm:$0xf] }
  0xb8   : > { %1130 = vmatpush.bf16.msra.mxu3 %v2587_v30  ;;  %2011 = vmatpush.bf16.msra.mxu0 %v2807_v26  ;;  %v2395_v32 = vor.u32 %v2743_v28, %v2392_v29  ;;  %v2771_v26 = vld [vmem:[%s3603_s6 + $0x10c] sm:$0xf]  ;;  %v2504_v28 = vld [vmem:[%s3603_s6 + $0x118] sm:$0xf0] }
  0xbb   : > { %1082 = vmatpush.bf16.msra.mxu2 %v2443_v34  ;;  %v2520_v34 = vld [vmem:[%s3603_s6 + $0x138] sm:$0xf0] }
  0xbc   : > { %1131 = vmatpush.bf16.msra.mxu3 %v2571_v36  ;;  %2012 = vmatpush.bf16.msra.mxu0 %v2806_v35  ;;  %v2523_v40 = vor.u32 %v2775_v33, %v2520_v34 }
  0xbe   : > { %808 = vmatmul.bf16.gmra.mxu0 %v3774_v15  ;;  %828 = vmatmul.bf16.gmra.mxu2 %v3776_v16 }
  0xbf   : > { %857 = vmatmul.bf16.gmra.mxu1 %v3778_v17  ;;  %1083 = vmatpush.bf16.msra.mxu2 %v2427_v42 }
  0xc0   : > { %1132 = vmatpush.bf16.msra.mxu3 %v2555_v44  ;;  %v2805_v44 = vld [vmem:[%s3610_s29 + $0x18] sm:$0xff] }
  0xc1   : > { %877 = vmatmul.bf16.gmra.mxu3 %v3780_v18  ;;  %2013 = vmatpush.bf16.msra.mxu0 %v2805_v44 }
  0xc3   : > { %1084 = vmatpush.bf16.msra.mxu2 %v2411_v3 }
  0xc4   : > { %1133 = vmatpush.bf16.msra.mxu3 %v2539_v8 }
  0xc7   : > { %1085 = vmatpush.bf16.msra.mxu2 %v2395_v32 }
  0xc8   : > { %1134 = vmatpush.bf16.msra.mxu3 %v2523_v40  ;;  %v2507_v40 = vor.u32 %v2771_v26, %v2504_v28 }
  0xcc   : > { %1135 = vmatpush.bf16.msra.mxu3 %v2507_v40 }
  0xce   : > { %891 = vmatmul.bf16.vlgmr.msrb.gmra.mxu2 %v3675_v0  ;;  %989 = vmatmul.bf16.vlgmr.msrb.gmra.mxu0 %v3675_v0 }
  0xcf   : > { %1038 = vmatmul.bf16.vlgmr.msrb.gmra.mxu1 %v3682_v5 }
  0xd1   : > { %940 = vmatmul.bf16.vlgmr.msrb.gmra.mxu3 %v3682_v5 }
  0xde   : > { %896 = vmatmul.bf16.gmra.mxu2 %v3719_v58  ;;  %994 = vmatmul.bf16.gmra.mxu0 %v3719_v58 }
  0xdf   : > { %1043 = vmatmul.bf16.gmra.mxu1 %v3726_v63 }
  0xe1   : > { %945 = vmatmul.bf16.gmra.mxu3 %v3726_v63 }
  0xee   : > { %901 = vmatmul.bf16.gmra.mxu2 %v3758_v51  ;;  %999 = vmatmul.bf16.gmra.mxu0 %v3758_v51 }
  0xef   : > { %1048 = vmatmul.bf16.gmra.mxu1 %v3762_v53 }
  0xf1   : > { %950 = vmatmul.bf16.gmra.mxu3 %v3762_v53 }
  0xfe   : > { %906 = vmatmul.bf16.gmra.mxu2 %v3774_v15  ;;  %1004 = vmatmul.bf16.gmra.mxu0 %v3774_v15 }
  0xff   : > { %1053 = vmatmul.bf16.gmra.mxu1 %v3778_v17 }
 0x101   : > { %955 = vmatmul.bf16.gmra.mxu3 %v3778_v17 }
 0x10b   : > { %v794_v37 = vpop.f32.mrf.mxu0 }
 0x10c   : > { %v843_v41 = vpop.f32.mrf.mxu1 }
 0x10d   : > { %v3834_v9 = vadd.f32 %v843_v41, %v794_v37 }
 0x10e   : > { %911 = vmatmul.bf16.gmra.mxu2 %v3677_v1  ;;  %1009 = vmatmul.bf16.gmra.mxu0 %v3677_v1 }
 0x10f   : > { %1058 = vmatmul.bf16.gmra.mxu1 %v3684_v6  ;;  %v2620_v21 = vmul.f32 -1.442695, %v3834_v9 }
 0x111   : > { %960 = vmatmul.bf16.gmra.mxu3 %v3684_v6  ;;  %v814_v45 = vpop.f32.mrf.mxu2  ;;  %2987 = vpow2.f32 %v2620_v21 }
 0x113   : > { %v796_v48 = vpop.f32.mrf.mxu0 }
 0x114   : > { %v863_v46 = vpop.f32.mrf.mxu3  ;;  %v845_v49 = vpop.f32.mrf.mxu1 }
 0x115   : > { %v3822_v47 = vadd.f32 %v863_v46, %v814_v45  ;;  %v3837_v13 = vadd.f32 %v845_v49, %v796_v48 }
 0x117   : > { %v2622_v23 = vmul.f32 -1.442695, %v3837_v13  ;;  %v2988_v36 = vpop.eup %2987 }
 0x118   : > { %v3860_v42 = vadd.f32 1.0, %v2988_v36 }
 0x119   : > { %v816_v50 = vpop.f32.mrf.mxu2  ;;  %2989 = vpow2.f32 %v2622_v23 }
 0x11a   : > { %2991 = vrcp.f32 %v3860_v42  ;;  %vm1310_vm0 = vweird.f32 %v3860_v42 }
 0x11b   : > { %v799_v57 = vpop.f32.mrf.mxu0 }
 0x11c   : > { %v865_v55 = vpop.f32.mrf.mxu3  ;;  %v848_v60 = vpop.f32.mrf.mxu1 }
 0x11d   : > { %v3824_v56 = vadd.f32 %v865_v55, %v816_v50  ;;  %v3854_v37 = vadd.f32 %v848_v60, %v799_v57  ;;  %v2804_v57 = vld [vmem:[%s3610_s29 + $0x10] sm:$0xff] }
 0x11e   : > { %916 = vmatmul.bf16.gmra.mxu2 %v3721_v59  ;;  %1014 = vmatmul.bf16.gmra.mxu0 %v3721_v59 }
 0x11f   : > { %1063 = vmatmul.bf16.gmra.mxu1 %v3728_v2  ;;  %v2990_v38 = vpop.eup %2989  ;;  %v2624_v45 = vmul.f32 -1.442695, %v3854_v37  ;;  %2014 = vmatpush.bf16.msra.mxu0 %v2804_v57 }
 0x120   : > { %v3864_v48 = vadd.f32 1.0, %v2990_v38  ;;  %v3875_v4 = vpop.eup %2991 }
 0x121   : > { %965 = vmatmul.bf16.gmra.mxu3 %v3728_v2  ;;  %v819_v10 = vpop.f32.mrf.mxu2  ;;  %2993 = vpow2.f32 %v2624_v45  ;;  %v1306_v21 = vmul.f32 %v3875_v4, %v3860_v42  ;;  %vm1311_vm1 = vweird.f32 %v3875_v4 }
 0x122   : > { %2995 = vrcp.f32 %v3864_v48  ;;  %vm1340_vm2 = vweird.f32 %v3864_v48  ;;  %vm3927_vm4 = vmor %vm1310_vm0, %vm1311_vm1  ;;  %v1344_v26 = vand.u32 2147483647, %v3864_v48 }
 0x123   : > { %v801_v14 = vpop.f32.mrf.mxu0  ;;  %2015 = vmatpush.bf16.msra.mxu0 %v2803_v62  ;;  %v1307_v38 = vsub.f32 1.0, %v1306_v21  ;;  %v1346_v21 = vand.u32 2147483648, %v3864_v48 }
 0x124   : > { %v868_v12 = vpop.f32.mrf.mxu3  ;;  %v850_v20 = vpop.f32.mrf.mxu1  ;;  %vm1345_vm7 = vcmp.eq.f32.partialorder %v1344_v26, 8.507059e+37 }
 0x125   : > { %v3839_v19 = vadd.f32 %v868_v12, %v819_v10  ;;  %v3858_v39 = vadd.f32 %v850_v20, %v801_v14  ;;  %v2739_v10 = vld [vmem:[%s3603_s6 + $0xc] sm:$0xf]  ;;  %v2802_v14 = vld [vmem:[%s3610_s29] sm:$0xff]  ;;  %v1308_v45 = vmul.f32 %v3875_v4, %v1307_v38  ;;  %s3221_s6 = scalar_lea.hbm %s3220_s21, 128 }
 0x126   : > { %v2379_v23 = vor.u32 %v2739_v10, %v2376_v11  ;;  %p3222_p8 = scmp.ne.s32.totalorder %s3220_s21, %s3221_s6 }
 0x127   : > { %v2626_v50 = vmul.f32 -1.442695, %v3858_v39  ;;  %v2994_v8 = vpop.eup %2993  ;;  %2016 = vmatpush.bf16.msra.mxu0 %v2802_v14  ;;  %v1309_v10 = vadd.f32 %v3875_v4, %v1308_v45 }
 0x128   : > { %v3881_v12 = vpop.eup %2995  ;;  %1086 = vmatpush.bf16.msra.mxu2 %v2379_v23  ;;  %p3223_p10 = pnand %p3222_p8, %p3534_p6 }
 0x129   : > { %v821_v24 = vpop.f32.mrf.mxu2  ;;  %2997 = vpow2.f32 %v2626_v50  ;;  %v1336_v32 = vmul.f32 %v3881_v12, %v3864_v48  ;;  %vm1341_vm3 = vweird.f32 %v3881_v12  ;;  %v1313_v48 = vsel %vm3927_vm4, %v3875_v4, %v1309_v10 }
 0x12a   : > { %vm3935_vm5 = vmor %vm1340_vm2, %vm1341_vm3  ;;  %p3224_p12 = pneg %p3223_p10 }
 0x12b   : > { %v804_v27 = vpop.f32.mrf.mxu0 }
 0x12c   : > { %v870_v25 = vpop.f32.mrf.mxu3  ;;  %v853_v30 = vpop.f32.mrf.mxu1 }
 0x12d   : > { %v3847_v31 = vadd.f32 %v870_v25, %v821_v24  ;;  %v3892_v24 = vadd.f32 1.0, %v2994_v8  ;;  %v3894_v25 = vadd.f32 %v853_v30, %v804_v27  ;;  %v1337_v30 = vsub.f32 1.0, %v1336_v32 }
 0x12e   : > { %921 = vmatmul.bf16.gmra.mxu2 %v3760_v52  ;;  %1019 = vmatmul.bf16.gmra.mxu0 %v3760_v52 }
 0x12f   : > { %1068 = vmatmul.bf16.gmra.mxu1 %v3764_v54  ;;  %v2998_v20 = vpop.eup %2997  ;;  %2999 = vrcp.f32 %v3892_v24  ;;  %v2628_v27 = vmul.f32 -1.442695, %v3894_v25  ;;  %vm1370_vm8 = vweird.f32 %v3892_v24 }
 0x130   : > { %v3900_v33 = vadd.f32 1.0, %v2998_v20 }
 0x131   : > { %970 = vmatmul.bf16.gmra.mxu3 %v3764_v54  ;;  %v824_v41 = vpop.f32.mrf.mxu2 }
 0x132   : > { %3001 = vrcp.f32 %v3900_v33  ;;  %vm1400_vm10 = vweird.f32 %v3900_v33 }
 0x133   : > { %v806_v46 = vpop.f32.mrf.mxu0  ;;  %3003 = vpow2.f32 %v2628_v27 }
 0x134   : > { %v873_v43 = vpop.f32.mrf.mxu3  ;;  %v855_v49 = vpop.f32.mrf.mxu1 }
 0x135   : > { %v3867_v55 = vadd.f32 %v873_v43, %v824_v41  ;;  %v3902_v34 = vadd.f32 %v855_v49, %v806_v46  ;;  %v1338_v49 = vmul.f32 %v3881_v12, %v1337_v30  ;;  %v3914_v57 = vpop.eup %2999 }
 0x136   : > { %vm1371_vm9 = vweird.f32 %v3914_v57 }
 0x137   : > { %v2630_v44 = vmul.f32 -1.442695, %v3902_v34  ;;  %v1339_v23 = vadd.f32 %v3881_v12, %v1338_v49  ;;  %vm3979_vm12 = vmor %vm1370_vm8, %vm1371_vm9 }
 0x138   : > { %v3918_v8 = vpop.eup %3001 }
 0x139   : > { %v826_v60 = vpop.f32.mrf.mxu2  ;;  %3005 = vpow2.f32 %v2630_v44  ;;  %v3004_v28 = vpop.eup %3003  ;;  %v1343_v30 = vsel %vm3935_vm5, %v3881_v12, %v1339_v23  ;;  %vm1401_vm11 = vweird.f32 %v3918_v8 }
 0x13a   : > { %v3954_v44 = vadd.f32 1.0, %v3004_v28  ;;  %v1374_v28 = vand.u32 2147483647, %v3892_v24  ;;  %vm3990_vm13 = vmor %vm1400_vm10, %vm1401_vm11 }
 0x13b   : > { %v3873_v3 = vpop.f32.mrf.mxu0 }
 0x13c   : > { %v875_v61 = vpop.f32.mrf.mxu3  ;;  %v3877_v7 = vpop.f32.mrf.mxu1  ;;  %3007 = vrcp.f32 %v3954_v44  ;;  %vm3996_vm14 = vcmp.eq.f32.partialorder %v1374_v28, 8.507059e+37  ;;  %v2636_v28 = vmul.f32 -1.442695, %v3822_v47  ;;  %vm1430_vm0 = vweird.f32 %v3954_v44 }
 0x13d   : > { %v3890_v22 = vadd.f32 %v875_v61, %v826_v60  ;;  %v1314_v60 = vand.u32 2147483647, %v3860_v42  ;;  %v1316_v61 = vand.u32 2147483648, %v3860_v42  ;;  %v1366_v42 = vmul.f32 %v3914_v57, %v3892_v24 }
 0x13e   : > { %926 = vmatmul.bf16.gmra.mxu2 %v3776_v16  ;;  %1024 = vmatmul.bf16.gmra.mxu0 %v3776_v16  ;;  %v3949_v40 = vadd.f32 %v3877_v7, %v3873_v3 }
 0x13f   : > { %1073 = vmatmul.bf16.gmra.mxu1 %v3780_v18  ;;  %v3006_v38 = vpop.eup %3005  ;;  %vm1315_vm6 = vcmp.eq.f32.partialorder %v1314_v60, 8.507059e+37  ;;  %v1367_v49 = vsub.f32 1.0, %v1366_v42 }
 0x140   : > { %v2632_v10 = vmul.f32 -1.442695, %v3949_v40 }
 0x141   : > { %975 = vmatmul.bf16.gmra.mxu3 %v3780_v18  ;;  %v829_v29 = vpop.f32.mrf.mxu2 }
 0x143   : > { %v811_v36 = vpop.f32.mrf.mxu0 }
 0x144   : > { %v878_v35 = vpop.f32.mrf.mxu3  ;;  %v860_v43 = vpop.f32.mrf.mxu1 }
 0x145   : > { %v3904_v41 = vadd.f32 %v878_v35, %v829_v29  ;;  %v1317_v29 = vor.u32 1.1754944e-38, %v1316_v61  ;;  %v1396_v35 = vmul.f32 %v3918_v8, %v3900_v33 }
 0x147   : > { %v1397_v4 = vsub.f32 1.0, %v1396_v35  ;;  %v1406_v35 = vand.u32 2147483648, %v3900_v33 }
 0x149   : > { %v831_v46 = vpop.f32.mrf.mxu2  ;;  %v1398_v20 = vmul.f32 %v3918_v8, %v1397_v4  ;;  %v2817_v4 = vld [vmem:[%s3610_s29 + $0x78] sm:$0xff] }
 0x14a   : > { %2058 = vmatpush.bf16.msra.mxu1 %v2817_v4 }
 0x14b   : > { %v990_v62 = vpop.f32.mrf.mxu0 }
 0x14c   : > { %v880_v50 = vpop.f32.mrf.mxu3  ;;  %v1039_v14 = vpop.f32.mrf.mxu1 }
 0x14d   : > { %v3923_v11 = vadd.f32 %v880_v50, %v831_v46  ;;  %v1318_v46 = vsel %vm1315_vm6, %v1317_v29, %v1313_v48  ;;  %v3958_v50 = vadd.f32 1.0, %v3006_v38  ;;  %v1040_v23 = vadd.f32 %v1039_v14, %v990_v62  ;;  %v3986_v48 = vpop.eup %3007 }
 0x14e   : > { %1087 = vmatmul.bf16.vlgmr.msra.gmra.mxu2 %v3675_v0  ;;  %v1347_v0 = vor.u32 1.1754944e-38, %v1346_v21  ;;  %v1785_v12 = vmul.f32 %v1318_v46, %v3834_v9  ;;  %v1376_v29 = vand.u32 2147483648, %v3892_v24  ;;  %v1399_v62 = vadd.f32 %v3918_v8, %v1398_v20 }
 0x14f   : > { %3009 = vrcp.f32 %v3958_v50  ;;  %v1404_v14 = vand.u32 2147483647, %v3900_v33  ;;  %vm1431_vm1 = vweird.f32 %v3986_v48  ;;  %vm1460_vm2 = vweird.f32 %v3958_v50 }
 0x150   : > { %v1348_v7 = vsel %vm1345_vm7, %v1347_v0, %v1343_v30  ;;  %3011 = vpow2.f32 %v2632_v10  ;;  %v1817_v24 = vmul.f32 %v1785_v12, %v1040_v23  ;;  %v1426_v12 = vmul.f32 %v3986_v48, %v3954_v44  ;;  %vm4049_vm4 = vmor %vm1430_vm0, %vm1431_vm1 }
 0x151   : > { %1136 = vmatmul.bf16.vlgmr.msra.gmra.mxu3 %v3682_v5  ;;  %v892_v27 = vpop.f32.mrf.mxu2  ;;  %v3956_v5 = vadd.f32 %v860_v43, %v811_v36  ;;  %v1368_v43 = vmul.f32 %v3914_v57, %v1367_v49  ;;  %v1787_v21 = vmul.f32 %v1348_v7, %v3837_v13  ;;  %v1377_v49 = vor.u32 1.1754944e-38, %v1376_v29 }
 0x152   : > { %vm1405_vm15 = vcmp.eq.f32.partialorder %v1404_v14, 8.507059e+37  ;;  %v1407_v7 = vor.u32 1.1754944e-38, %v1406_v35  ;;  %v1427_v29 = vsub.f32 1.0, %v1426_v12  ;;  %v1464_v4 = vand.u32 2147483647, %v3958_v50 }
 0x153   : > { %v992_v60 = vpop.f32.mrf.mxu0  ;;  %v2634_v36 = vmul.f32 -1.442695, %v3956_v5  ;;  %v1369_v42 = vadd.f32 %v3914_v57, %v1368_v43 }
 0x154   : > { %v941_v45 = vpop.f32.mrf.mxu3  ;;  %v1041_v3 = vpop.f32.mrf.mxu1  ;;  %v1428_v0 = vmul.f32 %v3986_v48, %v1427_v29  ;;  %vm1465_vm7 = vcmp.eq.f32.partialorder %v1464_v4, 8.507059e+37  ;;  %v2642_v4 = vmul.f32 -1.442695, %v3847_v31 }
 0x155   : > { %v3960_v61 = vadd.f32 %v941_v45, %v892_v27  ;;  %v1042_v26 = vadd.f32 %v1041_v3, %v992_v60  ;;  %3013 = vpow2.f32 %v2634_v36  ;;  %v3994_v45 = vpop.eup %3009  ;;  %v1373_v33 = vsel %vm3979_vm12, %v3914_v57, %v1369_v42 }
 0x156   : > { %v3012_v60 = vpop.eup %3011  ;;  %v1403_v3 = vsel %vm3990_vm13, %v3918_v8, %v1399_v62  ;;  %vm1461_vm3 = vweird.f32 %v3994_v45  ;;  %v1429_v12 = vadd.f32 %v3986_v48, %v1428_v0 }
 0x157   : > { %v1819_v27 = vmul.f32 %v1787_v21, %v1042_v26  ;;  %v4015_v20 = vadd.f32 1.0, %v3012_v60  ;;  %v1378_v21 = vsel %vm3996_vm14, %v1377_v49, %v1373_v33  ;;  %v1436_v49 = vand.u32 2147483648, %v3954_v44  ;;  %vm4060_vm5 = vmor %vm1460_vm2, %vm1461_vm3 }
 0x158   : > { %v1789_v62 = vmul.f32 %v1378_v21, %v3854_v37  ;;  %v1434_v37 = vand.u32 2147483647, %v3954_v44  ;;  %v1466_v60 = vand.u32 2147483648, %v3958_v50 }
 0x159   : > { %v894_v9 = vpop.f32.mrf.mxu2  ;;  %v1865_v36 = vpack.c.bf16 %v1819_v27, %v1817_v24  ;;  %3015 = vrcp.f32 %v4015_v20  ;;  %vm1490_vm8 = vweird.f32 %v4015_v20 }
 0x15a   : > { %vm1435_vm6 = vcmp.eq.f32.partialorder %v1434_v37, 8.507059e+37  ;;  %v1467_v29 = vor.u32 1.1754944e-38, %v1466_v60 }
 0x15b   : > { %v995_v38 = vpop.f32.mrf.mxu0  ;;  %v3014_v10 = vpop.eup %3013  ;;  %2017 = vmatmul.bf16.vlgmr.msra.gmra.mxu0 %v1865_v36 }
 0x15c   : > { %v943_v32 = vpop.f32.mrf.mxu3  ;;  %v1044_v30 = vpop.f32.mrf.mxu1  ;;  %v4019_v23 = vadd.f32 1.0, %v3014_v10 }
 0x15d   : > { %v4013_v43 = vadd.f32 %v943_v32, %v894_v9  ;;  %v2638_v32 = vmul.f32 -1.442695, %v3824_v56  ;;  %v1045_v35 = vadd.f32 %v1044_v30, %v995_v38 }
 0x15e   : > { %1092 = vmatmul.bf16.gmra.mxu2 %v3719_v58  ;;  %v1456_v58 = vmul.f32 %v3994_v45, %v3958_v50  ;;  %3017 = vrcp.f32 %v4019_v23  ;;  %v1433_v50 = vsel %vm4049_vm4, %v3986_v48, %v1429_v12  ;;  %v2815_v12 = vld [vmem:[%s3610_s29 + $0x68] sm:$0xff]  ;;  %vm1520_vm10 = vweird.f32 %v4019_v23 }
 0x15f   : > { %3019 = vpow2.f32 %v2636_v28  ;;  %v1821_v38 = vmul.f32 %v1789_v62, %v1045_v35  ;;  %v4042_v10 = vpop.eup %3015  ;;  %v1437_v28 = vor.u32 1.1754944e-38, %v1436_v49 }
 0x160   : > { %v1457_v42 = vsub.f32 1.0, %v1456_v58  ;;  %3021 = vpow2.f32 %v2638_v32  ;;  %vm1491_vm9 = vweird.f32 %v4042_v10 }
 0x161   : > { %1141 = vmatmul.bf16.gmra.mxu3 %v3726_v63  ;;  %v897_v57 = vpop.f32.mrf.mxu2  ;;  %v1408_v63 = vsel %vm1405_vm15, %v1407_v7, %v1403_v3  ;;  %v2816_v7 = vld [vmem:[%s3610_s29 + $0x70] sm:$0xff]  ;;  %vm4104_vm12 = vmor %vm1490_vm8, %vm1491_vm9 }
 0x162   : > { %v1791_v14 = vmul.f32 %v1408_v63, %v3858_v39  ;;  %v1458_v24 = vmul.f32 %v3994_v45, %v1457_v42  ;;  %2059 = vmatpush.bf16.msra.mxu1 %v2816_v7 }
 0x163   : > { %v997_v26 = vpop.f32.mrf.mxu0 }
 0x164   : > { %v946_v8 = vpop.f32.mrf.mxu3  ;;  %v1046_v9 = vpop.f32.mrf.mxu1  ;;  %v1459_v36 = vadd.f32 %v3994_v45, %v1458_v24 }
 0x165   : > { %v4022_v13 = vadd.f32 %v946_v8, %v897_v57  ;;  %v1047_v27 = vadd.f32 %v1046_v9, %v997_v26  ;;  %v4054_v8 = vpop.eup %3017  ;;  %v1486_v9 = vmul.f32 %v4042_v10, %v4015_v20 }
 0x166   : > { %v3020_v63 = vpop.eup %3019  ;;  %v1463_v42 = vsel %vm4060_vm5, %v3994_v45, %v1459_v36  ;;  %vm1521_vm11 = vweird.f32 %v4054_v8  ;;  %v1496_v36 = vand.u32 2147483648, %v4015_v20  ;;  %2060 = vmatpush.bf16.msra.mxu1 %v2815_v12 }
 0x167   : > { %v1823_v30 = vmul.f32 %v1791_v14, %v1047_v27  ;;  %v3022_v26 = vpop.eup %3021  ;;  %v4076_v14 = vadd.f32 1.0, %v3020_v63  ;;  %v1468_v35 = vsel %vm1465_vm7, %v1467_v29, %v1463_v42  ;;  %v1487_v48 = vsub.f32 1.0, %v1486_v9  ;;  %vm4117_vm13 = vmor %vm1520_vm10, %vm1521_vm11 }
 0x168   : > { %v4078_v24 = vadd.f32 1.0, %v3022_v26  ;;  %v2814_v26 = vld [vmem:[%s3610_s29 + $0x60] sm:$0xff] }
 0x169   : > { %v899_v39 = vpop.f32.mrf.mxu2  ;;  %v1867_v44 = vpack.c.bf16 %v1823_v30, %v1821_v38  ;;  %v1795_v30 = vmul.f32 %v1468_v35, %v3902_v34  ;;  %3023 = vrcp.f32 %v4076_v14  ;;  %v1488_v60 = vmul.f32 %v4042_v10, %v1487_v48 }
 0x16a   : > { %3025 = vrcp.f32 %v4078_v24  ;;  %2061 = vmatpush.bf16.msra.mxu1 %v2814_v26  ;;  %vm1550_vm2 = vweird.f32 %v4076_v14  ;;  %vm1580_vm4 = vweird.f32 %v4078_v24 }
 0x16b   : > { %v1000_v3 = vpop.f32.mrf.mxu0  ;;  %2022 = vmatmul.bf16.gmra.mxu0 %v1867_v44  ;;  %v1489_v44 = vadd.f32 %v4042_v10, %v1488_v60 }
 0x16c   : > { %v948_v46 = vpop.f32.mrf.mxu3  ;;  %v1049_v57 = vpop.f32.mrf.mxu1 }
 0x16d   : > { %v4039_v33 = vadd.f32 %v948_v46, %v899_v39  ;;  %v2640_v39 = vmul.f32 -1.442695, %v3839_v19  ;;  %v1050_v46 = vadd.f32 %v1049_v57, %v1000_v3  ;;  %v1526_v57 = vand.u32 2147483648, %v4019_v23 }
 0x16e   : > { %1097 = vmatmul.bf16.gmra.mxu2 %v3758_v51  ;;  %v1516_v51 = vmul.f32 %v4054_v8, %v4019_v23 }
 0x16f   : > { %3027 = vpow2.f32 %v2640_v39  ;;  %v4111_v9 = vpop.eup %3023  ;;  %v1527_v35 = vor.u32 1.1754944e-38, %v1526_v57 }
 0x170   : > { %v1517_v27 = vsub.f32 1.0, %v1516_v51  ;;  %3029 = vpow2.f32 %v2642_v4  ;;  %vm1551_vm0 = vweird.f32 %v4111_v9 }
 0x171   : > { %1146 = vmatmul.bf16.gmra.mxu3 %v3762_v53  ;;  %v902_v32 = vpop.f32.mrf.mxu2  ;;  %v1438_v53 = vsel %vm1435_vm6, %v1437_v28, %v1433_v50  ;;  %v1494_v28 = vand.u32 2147483647, %v4015_v20  ;;  %v1524_v50 = vand.u32 2147483647, %v4019_v23  ;;  %vm4164_vm3 = vmor %vm1550_vm2, %vm1551_vm0 }
 0x172   : > { %v1793_v38 = vmul.f32 %v1438_v53, %v3894_v25  ;;  %v1518_v7 = vmul.f32 %v4054_v8, %v1517_v27  ;;  %v1497_v53 = vor.u32 1.1754944e-38, %v1496_v36  ;;  %v1546_v27 = vmul.f32 %v4111_v9, %v4076_v14 }
 0x173   : > { %v1002_v0 = vpop.f32.mrf.mxu0  ;;  %vm1495_vm14 = vcmp.eq.f32.partialorder %v1494_v28, 8.507059e+37  ;;  %vm1525_vm15 = vcmp.eq.f32.partialorder %v1524_v50, 8.507059e+37 }
 0x174   : > { %v951_v62 = vpop.f32.mrf.mxu3  ;;  %v1051_v45 = vpop.f32.mrf.mxu1  ;;  %v1825_v34 = vmul.f32 %v1793_v38, %v1050_v46  ;;  %v1519_v29 = vadd.f32 %v4054_v8, %v1518_v7  ;;  %v1547_v4 = vsub.f32 1.0, %v1546_v27  ;;  %v2644_v7 = vmul.f32 -1.442695, %v3867_v55 }
 0x175   : > { %v4080_v37 = vadd.f32 %v951_v62, %v902_v32  ;;  %v1052_v49 = vadd.f32 %v1051_v45, %v1002_v0  ;;  %v4121_v32 = vpop.eup %3025  ;;  %v1493_v0 = vsel %vm4104_vm12, %v4042_v10, %v1489_v44  ;;  %v1584_v27 = vand.u32 2147483647, %v4078_v24 }
 0x176   : > { %v3028_v20 = vpop.eup %3027  ;;  %v1523_v23 = vsel %vm4117_vm13, %v4054_v8, %v1519_v29  ;;  %v1498_v38 = vsel %vm1495_vm14, %v1497_v53, %v1493_v0  ;;  %v1548_v36 = vmul.f32 %v4111_v9, %v1547_v4  ;;  %vm1581_vm1 = vweird.f32 %v4121_v32 }
 0x177   : > { %v1827_v3 = vmul.f32 %v1795_v30, %v1052_v49  ;;  %v3030_v48 = vpop.eup %3029  ;;  %v4135_v39 = vadd.f32 1.0, %v3028_v20  ;;  %v1528_v10 = vsel %vm1525_vm15, %v1527_v35, %v1523_v23  ;;  %v1556_v53 = vand.u32 2147483648, %v4076_v14  ;;  %vm4172_vm5 = vmor %vm1580_vm4, %vm1581_vm1 }
 0x178   : > { %v4139_v8 = vadd.f32 1.0, %v3030_v48  ;;  %v1799_v12 = vmul.f32 %v1528_v10, %v3956_v5  ;;  %v1549_v51 = vadd.f32 %v4111_v9, %v1548_v36  ;;  %v1586_v35 = vand.u32 2147483648, %v4078_v24 }
 0x179   : > { %v904_v25 = vpop.f32.mrf.mxu2  ;;  %v1869_v62 = vpack.c.bf16 %v1827_v3, %v1825_v34  ;;  %3031 = vrcp.f32 %v4135_v39  ;;  %v1554_v48 = vand.u32 2147483647, %v4076_v14  ;;  %v1557_v10 = vor.u32 1.1754944e-38, %v1556_v53 }
 0x17a   : > { %3033 = vrcp.f32 %v4139_v8  ;;  %vm1585_vm7 = vcmp.eq.f32.partialorder %v1584_v27, 8.507059e+37  ;;  %vm1610_vm10 = vweird.f32 %v4135_v39  ;;  %vm1640_vm12 = vweird.f32 %v4139_v8 }
 0x17b   : > { %v1005_v63 = vpop.f32.mrf.mxu0  ;;  %2027 = vmatmul.bf16.gmra.mxu0 %v1869_v62  ;;  %3035 = vpow2.f32 %v2644_v7  ;;  %vm1555_vm6 = vcmp.eq.f32.partialorder %v1554_v48, 8.507059e+37 }
 0x17c   : > { %v953_v58 = vpop.f32.mrf.mxu3  ;;  %v1054_v42 = vpop.f32.mrf.mxu1 }
 0x17d   : > { %v4097_v21 = vadd.f32 %v953_v58, %v904_v25  ;;  %v1797_v25 = vmul.f32 %v1498_v38, %v3949_v40  ;;  %v1055_v34 = vadd.f32 %v1054_v42, %v1005_v63  ;;  %v2646_v58 = vmul.f32 -1.442695, %v3890_v22 }
 0x17e   : > { %1102 = vmatmul.bf16.gmra.mxu2 %v3774_v15  ;;  %v1576_v15 = vmul.f32 %v4121_v32, %v4078_v24 }
 0x17f   : > { %v1829_v28 = vmul.f32 %v1797_v25, %v1055_v34  ;;  %3037 = vpow2.f32 %v2646_v58  ;;  %v4153_v42 = vpop.eup %3031 }
 0x180   : > { %v1577_v60 = vsub.f32 1.0, %v1576_v15  ;;  %v4158_v20 = vpop.eup %3033  ;;  %v1606_v38 = vmul.f32 %v4153_v42, %v4135_v39  ;;  %vm1611_vm8 = vweird.f32 %v4153_v42 }
 0x181   : > { %1151 = vmatmul.bf16.gmra.mxu3 %v3778_v17  ;;  %v907_v45 = vpop.f32.mrf.mxu2  ;;  %v3036_v15 = vpop.eup %3035  ;;  %vm1641_vm9 = vweird.f32 %v4158_v20  ;;  %vm4215_vm11 = vmor %vm1610_vm10, %vm1611_vm8 }
 0x182   : > { %v1578_v57 = vmul.f32 %v4121_v32, %v1577_v60  ;;  %v4186_v4 = vadd.f32 1.0, %v3036_v15  ;;  %v1607_v34 = vsub.f32 1.0, %v1606_v38  ;;  %v1644_v38 = vand.u32 2147483647, %v4139_v8  ;;  %vm4223_vm13 = vmor %vm1640_vm12, %vm1641_vm9 }
 0x183   : > { %v1007_v46 = vpop.f32.mrf.mxu0 }
 0x184   : > { %v956_v17 = vpop.f32.mrf.mxu3  ;;  %v1056_v49 = vpop.f32.mrf.mxu1  ;;  %v1579_v62 = vadd.f32 %v4121_v32, %v1578_v57  ;;  %v2648_v57 = vmul.f32 -1.442695, %v3904_v41  ;;  %3039 = vrcp.f32 %v4186_v4  ;;  %vm1645_vm15 = vcmp.eq.f32.partialorder %v1644_v38, 8.507059e+37 }
 0x185   : > { %v4137_v30 = vadd.f32 %v956_v17, %v907_v45  ;;  %v1057_v3 = vadd.f32 %v1056_v49, %v1007_v46  ;;  %v3038_v17 = vpop.eup %3037  ;;  %v1587_v46 = vor.u32 1.1754944e-38, %v1586_v35  ;;  %v1616_v45 = vand.u32 2147483648, %v4135_v39 }
 0x186   : > { %v1583_v14 = vsel %vm4172_vm5, %v4121_v32, %v1579_v62  ;;  %v4190_v25 = vadd.f32 1.0, %v3038_v17  ;;  %v1646_v17 = vand.u32 2147483648, %v4139_v8  ;;  %vm1670_vm2 = vweird.f32 %v4186_v4 }
 0x187   : > { %v1831_v29 = vmul.f32 %v1799_v12, %v1057_v3  ;;  %v1588_v32 = vsel %vm1585_vm7, %v1587_v46, %v1583_v14  ;;  %v1614_v14 = vand.u32 2147483647, %v4135_v39  ;;  %v1676_v38 = vand.u32 2147483648, %v4186_v4 }
 0x188   : > { %v1803_v26 = vmul.f32 %v1588_v32, %v3824_v56  ;;  %3041 = vrcp.f32 %v4190_v25  ;;  %vm1700_vm4 = vweird.f32 %v4190_v25 }
 0x189   : > { %v909_v44 = vpop.f32.mrf.mxu2  ;;  %v1871_v0 = vpack.c.bf16 %v1831_v29, %v1829_v28  ;;  %v2650_v28 = vmul.f32 -1.442695, %v3923_v11  ;;  %v1608_v29 = vmul.f32 %v4153_v42, %v1607_v34  ;;  %3043 = vpow2.f32 %v2648_v57 }
 0x18a   : > { %v4204_v23 = vpop.eup %3039  ;;  %vm1615_vm14 = vcmp.eq.f32.partialorder %v1614_v14, 8.507059e+37 }
 0x18b   : > { %v1010_v63 = vpop.f32.mrf.mxu0  ;;  %2032 = vmatmul.bf16.gmra.mxu0 %v1871_v0  ;;  %3045 = vpow2.f32 %v2650_v28  ;;  %v1609_v48 = vadd.f32 %v4153_v42, %v1608_v29  ;;  %v1666_v46 = vmul.f32 %v4204_v23, %v4186_v4  ;;  %vm1671_vm0 = vweird.f32 %v4204_v23 }
 0x18c   : > { %v958_v40 = vpop.f32.mrf.mxu3  ;;  %v1059_v50 = vpop.f32.mrf.mxu1 }
 0x18d   : > { %v4150_v5 = vadd.f32 %v958_v40, %v909_v44  ;;  %v1060_v58 = vadd.f32 %v1059_v50, %v1010_v63  ;;  %v2813_v50 = vld [vmem:[%s3610_s29 + $0x58] sm:$0xff] }
 0x18e   : > { %1107 = vmatmul.bf16.gmra.mxu2 %v3677_v1  ;;  %v1553_v1 = vsel %vm4164_vm3, %v4111_v9, %v1549_v51  ;;  %2062 = vmatpush.bf16.msra.mxu1 %v2813_v50  ;;  %v4209_v15 = vpop.eup %3041  ;;  %vm4266_vm3 = vmor %vm1670_vm2, %vm1671_vm0 }
 0x18f   : > { %v1558_v7 = vsel %vm1555_vm6, %v1557_v10, %v1553_v1  ;;  %vm1701_vm1 = vweird.f32 %v4209_v15 }
 0x190   : > { %v1801_v44 = vmul.f32 %v1558_v7, %v3822_v47  ;;  %vm4274_vm5 = vmor %vm1700_vm4, %vm1701_vm1 }
 0x191   : > { %1156 = vmatmul.bf16.gmra.mxu3 %v3684_v6  ;;  %v1636_v6 = vmul.f32 %v4158_v20, %v4139_v8  ;;  %v912_v24 = vpop.f32.mrf.mxu2 }
 0x192   : > { %v1833_v51 = vmul.f32 %v1801_v44, %v1060_v58 }
 0x193   : > { %v1012_v60 = vpop.f32.mrf.mxu0  ;;  %v1637_v3 = vsub.f32 1.0, %v1636_v6  ;;  %v3044_v6 = vpop.eup %3043 }
 0x194   : > { %v961_v49 = vpop.f32.mrf.mxu3  ;;  %v1061_v12 = vpop.f32.mrf.mxu1  ;;  %v4237_v32 = vadd.f32 1.0, %v3044_v6  ;;  %v1706_v6 = vand.u32 2147483648, %v4190_v25 }
 0x195   : > { %v4188_v9 = vadd.f32 %v961_v49, %v912_v24  ;;  %v1062_v36 = vadd.f32 %v1061_v12, %v1012_v60  ;;  %v1638_v40 = vmul.f32 %v4158_v20, %v1637_v3  ;;  %v3046_v10 = vpop.eup %3045  ;;  %v1617_v49 = vor.u32 1.1754944e-38, %v1616_v45 }
 0x196   : > { %v1647_v60 = vor.u32 1.1754944e-38, %v1646_v17  ;;  %v4241_v3 = vadd.f32 1.0, %v3046_v10  ;;  %3047 = vrcp.f32 %v4237_v32  ;;  %v1674_v10 = vand.u32 2147483647, %v4186_v4 }
 0x197   : > { %v1835_v62 = vmul.f32 %v1803_v26, %v1062_v36  ;;  %v1639_v27 = vadd.f32 %v4158_v20, %v1638_v40  ;;  %v1667_v36 = vsub.f32 1.0, %v1666_v46  ;;  %vm1730_vm10 = vweird.f32 %v4237_v32 }
 0x198   : > { %3049 = vrcp.f32 %v4241_v3  ;;  %vm1675_vm6 = vcmp.eq.f32.partialorder %v1674_v10, 8.507059e+37  ;;  %v1734_v10 = vand.u32 2147483647, %v4237_v32  ;;  %vm1760_vm12 = vweird.f32 %v4241_v3 }
 0x199   : > { %v914_v63 = vpop.f32.mrf.mxu2  ;;  %v1873_v56 = vpack.c.bf16 %v1835_v62, %v1833_v51  ;;  %v1643_v39 = vsel %vm4223_vm13, %v4158_v20, %v1639_v27  ;;  %v1668_v40 = vmul.f32 %v4204_v23, %v1667_v36 }
 0x19a   : > { %v1648_v20 = vsel %vm1645_vm15, %v1647_v60, %v1643_v39 }
 0x19b   : > { %v1015_v35 = vpop.f32.mrf.mxu0  ;;  %2037 = vmatmul.bf16.gmra.mxu0 %v1873_v56  ;;  %v1807_v29 = vmul.f32 %v1648_v20, %v3847_v31  ;;  %v2621_v56 = vmul.f32 -1.442695, %v3960_v61  ;;  %v1669_v17 = vadd.f32 %v4204_v23, %v1668_v40 }
 0x19c   : > { %v963_v53 = vpop.f32.mrf.mxu3  ;;  %v1064_v0 = vpop.f32.mrf.mxu1 }
 0x19d   : > { %v4201_v47 = vadd.f32 %v963_v53, %v914_v63  ;;  %v1065_v44 = vadd.f32 %v1064_v0, %v1015_v35  ;;  %v2812_v53 = vld [vmem:[%s3610_s29 + $0x50] sm:$0xff]  ;;  %v2623_v0 = vmul.f32 -1.442695, %v4013_v43  ;;  %v4255_v45 = vpop.eup %3047  ;;  %3051 = vpow2.f32 %v2621_v56  ;;  %v2811_v56 = vld [vmem:[%s3610_s29 + $0x48] sm:$0xff] }
 0x19e   : > { %1112 = vmatmul.bf16.gmra.mxu2 %v3721_v59  ;;  %v1613_v59 = vsel %vm4215_vm11, %v4153_v42, %v1609_v48  ;;  %2063 = vmatpush.bf16.msra.mxu1 %v2812_v53  ;;  %v4260_v14 = vpop.eup %3049  ;;  %v1726_v4 = vmul.f32 %v4255_v45, %v4237_v32  ;;  %vm1731_vm8 = vweird.f32 %v4255_v45 }
 0x19f   : > { %v1618_v34 = vsel %vm1615_vm14, %v1617_v49, %v1613_v59  ;;  %v1704_v59 = vand.u32 2147483647, %v4190_v25  ;;  %3053 = vpow2.f32 %v2623_v0  ;;  %vm1761_vm9 = vweird.f32 %v4260_v14  ;;  %vm4313_vm11 = vmor %vm1730_vm10, %vm1731_vm8 }
 0x1a0   : > { %v1805_v28 = vmul.f32 %v1618_v34, %v3839_v19  ;;  %vm4321_vm13 = vmor %vm1760_vm12, %vm1761_vm9  ;;  %vm1735_vm14 = vcmp.eq.f32.partialorder %v1734_v10, 8.507059e+37 }
 0x1a1   : > { %1161 = vmatmul.bf16.gmra.mxu3 %v3728_v2  ;;  %v1696_v2 = vmul.f32 %v4209_v15, %v4190_v25  ;;  %v917_v8 = vpop.f32.mrf.mxu2  ;;  %v1756_v25 = vmul.f32 %v4260_v14, %v4241_v3  ;;  %vm1705_vm7 = vcmp.eq.f32.partialorder %v1704_v59, 8.507059e+37  ;;  %v1764_v59 = vand.u32 2147483647, %v4241_v3 }
 0x1a2   : > { %v1837_v62 = vmul.f32 %v1805_v28, %v1065_v44  ;;  %2064 = vmatpush.bf16.msra.mxu1 %v2811_v56  ;;  %v2631_v56 = vmul.f32 -1.442695, %v4097_v21 }
 0x1a3   : > { %v1017_v12 = vpop.f32.mrf.mxu0  ;;  %v1697_v57 = vsub.f32 1.0, %v1696_v2  ;;  %v1757_v36 = vsub.f32 1.0, %v1756_v25  ;;  %vm1765_vm15 = vcmp.eq.f32.partialorder %v1764_v59, 8.507059e+37 }
 0x1a4   : > { %v966_v7 = vpop.f32.mrf.mxu3  ;;  %v1066_v58 = vpop.f32.mrf.mxu1 }
 0x1a5   : > { %v4239_v42 = vadd.f32 %v966_v7, %v917_v8  ;;  %v1067_v26 = vadd.f32 %v1066_v58, %v1017_v12  ;;  %v1698_v51 = vmul.f32 %v4209_v15, %v1697_v57  ;;  %v1707_v8 = vor.u32 1.1754944e-38, %v1706_v6  ;;  %v3052_v7 = vpop.eup %3051 }
 0x1a6   : > { %v3054_v20 = vpop.eup %3053  ;;  %v1727_v58 = vsub.f32 1.0, %v1726_v4  ;;  %v1766_v6 = vand.u32 2147483648, %v4241_v3 }
 0x1a7   : > { %v1839_v63 = vmul.f32 %v1807_v29, %v1067_v26  ;;  %v1699_v1 = vadd.f32 %v4209_v15, %v1698_v51  ;;  %v4292_v29 = vadd.f32 1.0, %v3052_v7  ;;  %v4294_v40 = vadd.f32 1.0, %v3054_v20  ;;  %v2810_v7 = vld [vmem:[%s3610_s29 + $0x40] sm:$0xff]  ;;  %s3225_s29 = scalar_lea.hbm %s4764_s0, 256 }
 0x1a8   : > { %v1728_v51 = vmul.f32 %v4255_v45, %v1727_v58  ;;  %2065 = vmatpush.bf16.msra.mxu1 %v2810_v7  ;;  %p3227_p1 = scmp.lt.s32.totalorder %s3225_s29, %s3221_s6 }
 0x1a9   : > { %v919_v50 = vpop.f32.mrf.mxu2  ;;  %v1875_v31 = vpack.c.bf16 %v1839_v63, %v1837_v62  ;;  %v1703_v46 = vsel %vm4274_vm5, %v4209_v15, %v1699_v1  ;;  %v1758_v62 = vmul.f32 %v4260_v14, %v1757_v36  ;;  %3055 = vrcp.f32 %v4292_v29 }
 0x1aa   : > { %v1708_v34 = vsel %vm1705_vm7, %v1707_v8, %v1703_v46  ;;  %3057 = vrcp.f32 %v4294_v40  ;;  %vm1325_vm2 = vweird.f32 %v4292_v29  ;;  %vm1355_vm4 = vweird.f32 %v4294_v40  ;;  %p3228_p4 = por %p3227_p1, %p3226_p11 }
 0x1ab   : > { %v1020_v48 = vpop.f32.mrf.mxu0  ;;  %2042 = vmatmul.bf16.gmra.mxu0 %v1875_v31  ;;  %v1811_v28 = vmul.f32 %v1708_v34, %v3890_v22  ;;  %v1759_v1 = vadd.f32 %v4260_v14, %v1758_v62  ;;  %v1359_v10 = vand.u32 2147483647, %v4294_v40 }
 0x1ac   : > { %v968_v35 = vpop.f32.mrf.mxu3  ;;  %v1069_v27 = vpop.f32.mrf.mxu1  ;;  %p3229_p3 = pnand %p3228_p4, %p3224_p12 }
 0x1ad   : > { %v4252_v19 = vadd.f32 %v968_v35, %v919_v50  ;;  %v1070_v57 = vadd.f32 %v1069_v27, %v1020_v48  ;;  %v2625_v35 = vmul.f32 -1.442695, %v4022_v13  ;;  %vm1360_vm7 = vcmp.eq.f32.partialorder %v1359_v10, 8.507059e+37 }
 0x1ae   : > { %1117 = vmatmul.bf16.gmra.mxu2 %v3760_v52  ;;  %v1673_v52 = vsel %vm4266_vm3, %v4204_v23, %v1669_v17  ;;  %v1729_v17 = vadd.f32 %v4255_v45, %v1728_v51 }
 0x1af   : > { %3059 = vpow2.f32 %v2625_v35 }
 0x1b1   : > { %1166 = vmatmul.bf16.gmra.mxu3 %v3764_v54  ;;  %v922_v2 = vpop.f32.mrf.mxu2  ;;  %v1677_v54 = vor.u32 1.1754944e-38, %v1676_v38  ;;  %v1736_v38 = vand.u32 2147483648, %v4237_v32  ;;  %v1763_v32 = vsel %vm4321_vm13, %v4260_v14, %v1759_v1 }
 0x1b3   : > { %v1022_v23 = vpop.f32.mrf.mxu0  ;;  %v1678_v12 = vsel %vm1675_vm6, %v1677_v54, %v1673_v52  ;;  %v4325_v52 = vpop.eup %3055  ;;  %v1737_v4 = vor.u32 1.1754944e-38, %v1736_v38  ;;  %v1329_v38 = vand.u32 2147483647, %v4292_v29 }
 0x1b4   : > { %v971_v49 = vpop.f32.mrf.mxu3  ;;  %v1071_v15 = vpop.f32.mrf.mxu1  ;;  %v1809_v26 = vmul.f32 %v1678_v12, %v3867_v55  ;;  %v2627_v55 = vmul.f32 -1.442695, %v4039_v33  ;;  %vm1326_vm0 = vweird.f32 %v4325_v52 }
 0x1b5   : > { %v4288_v60 = vadd.f32 %v971_v49, %v922_v2  ;;  %v1072_v44 = vadd.f32 %v1071_v15, %v1022_v23  ;;  %v4333_v3 = vpop.eup %3057  ;;  %v1321_v23 = vmul.f32 %v4325_v52, %v4292_v29  ;;  %vm1327_vm3 = vmor %vm1325_vm2, %vm1326_vm0  ;;  %vm1330_vm6 = vcmp.eq.f32.partialorder %v1329_v38, 8.507059e+37 }
 0x1b6   : > { %v1841_v63 = vmul.f32 %v1809_v26, %v1070_v57  ;;  %3061 = vpow2.f32 %v2627_v55  ;;  %v3060_v8 = vpop.eup %3059  ;;  %v1351_v34 = vmul.f32 %v4333_v3, %v4294_v40  ;;  %vm1356_vm1 = vweird.f32 %v4333_v3 }
 0x1b7   : > { %v1843_v50 = vmul.f32 %v1811_v28, %v1072_v44  ;;  %v4344_v57 = vadd.f32 1.0, %v3060_v8  ;;  %v1322_v44 = vsub.f32 1.0, %v1321_v23  ;;  %vm1357_vm5 = vmor %vm1355_vm4, %vm1356_vm1 }
 0x1b8   : > { %v1352_v28 = vsub.f32 1.0, %v1351_v34  ;;  %v2635_v34 = vmul.f32 -1.442695, %v4150_v5 }
 0x1b9   : > { %v924_v53 = vpop.f32.mrf.mxu2  ;;  %v1877_v31 = vpack.c.bf16 %v1843_v50, %v1841_v63  ;;  %v2629_v50 = vmul.f32 -1.442695, %v4080_v37  ;;  %3063 = vrcp.f32 %v4344_v57  ;;  %vm1385_vm10 = vweird.f32 %v4344_v57 }
 0x1bb   : > { %v1025_v48 = vpop.f32.mrf.mxu0  ;;  %2047 = vmatmul.bf16.gmra.mxu0 %v1877_v31 }
 0x1bc   : > { %v973_v0 = vpop.f32.mrf.mxu3  ;;  %v1074_v27 = vpop.f32.mrf.mxu1 }
 0x1bd   : > { %v4302_v22 = vadd.f32 %v973_v0, %v924_v53  ;;  %v3062_v12 = vpop.eup %3061  ;;  %v1075_v15 = vadd.f32 %v1074_v27, %v1025_v48  ;;  %v1353_v0 = vmul.f32 %v4333_v3, %v1352_v28  ;;  %v1331_v48 = vand.u32 2147483648, %v4292_v29 }
 0x1be   : > { %1122 = vmatmul.bf16.gmra.mxu2 %v3776_v16  ;;  %v1733_v16 = vsel %vm4313_vm11, %v4255_v45, %v1729_v17  ;;  %v4346_v26 = vadd.f32 1.0, %v3062_v12 }
 0x1bf   : > { %v1738_v49 = vsel %vm1735_vm14, %v1737_v4, %v1733_v16  ;;  %v4358_v31 = vpop.eup %3063  ;;  %v1354_v27 = vadd.f32 %v4333_v3, %v1353_v0 }
 0x1c0   : > { %v1813_v58 = vmul.f32 %v1738_v49, %v3904_v41  ;;  %3065 = vrcp.f32 %v4346_v26  ;;  %v1381_v16 = vmul.f32 %v4358_v31, %v4344_v57  ;;  %vm1386_vm8 = vweird.f32 %v4358_v31 }
 0x1c1   : > { %1171 = vmatmul.bf16.gmra.mxu3 %v3780_v18  ;;  %v927_v46 = vpop.f32.mrf.mxu2  ;;  %v1767_v18 = vor.u32 1.1754944e-38, %v1766_v6  ;;  %3067 = vpow2.f32 %v2629_v50  ;;  %v1361_v6 = vand.u32 2147483648, %v4294_v40  ;;  %v1358_v29 = vsel %vm1357_vm5, %v4333_v3, %v1354_v27  ;;  %vm1387_vm11 = vmor %vm1385_vm10, %vm1386_vm8 }
 0x1c2   : > { %v1845_v51 = vmul.f32 %v1813_v58, %v1075_v15  ;;  %3069 = vpow2.f32 %v2631_v56  ;;  %v1382_v8 = vsub.f32 1.0, %v1381_v16  ;;  %v2633_v3 = vmul.f32 -1.442695, %v4137_v30 }
 0x1c3   : > { %v1027_v54 = vpop.f32.mrf.mxu0  ;;  %v1768_v45 = vsel %vm1765_vm15, %v1767_v18, %v1763_v32  ;;  %v1362_v18 = vor.u32 1.1754944e-38, %v1361_v6  ;;  %v1421_v56 = vand.u32 2147483648, %v4346_v26  ;;  %vm1415_vm12 = vweird.f32 %v4346_v26 }
 0x1c4   : > { %v976_v25 = vpop.f32.mrf.mxu3  ;;  %v1076_v14 = vpop.f32.mrf.mxu1  ;;  %v1815_v36 = vmul.f32 %v1768_v45, %v3923_v11  ;;  %v1323_v11 = vmul.f32 %v4325_v52, %v1322_v44 }
 0x1c5   : > { %v4335_v2 = vadd.f32 %v976_v25, %v927_v46  ;;  %v1077_v20 = vadd.f32 %v1076_v14, %v1027_v54  ;;  %v1332_v46 = vor.u32 1.1754944e-38, %v1331_v48  ;;  %v1363_v40 = vsel %vm1360_vm7, %v1362_v18, %v1358_v29 }
 0x1c6   : > { %v1324_v55 = vadd.f32 %v4325_v52, %v1323_v11  ;;  %v4363_v1 = vpop.eup %3065  ;;  %v1788_v12 = vmul.f32 %v1363_v40, %v4013_v43  ;;  %v1419_v11 = vand.u32 2147483647, %v4346_v26  ;;  %v1422_v6 = vor.u32 1.1754944e-38, %v1421_v56 }
 0x1c7   : > { %v1847_v62 = vmul.f32 %v1815_v36, %v1077_v20  ;;  %v3068_v59 = vpop.eup %3067  ;;  %v1411_v4 = vmul.f32 %v4363_v1, %v4346_v26  ;;  %v1383_v20 = vmul.f32 %v4358_v31, %v1382_v8  ;;  %vm1416_vm9 = vweird.f32 %v4363_v1 }
 0x1c8   : > { %v1328_v39 = vsel %vm1327_vm3, %v4325_v52, %v1324_v55  ;;  %v3070_v32 = vpop.eup %3069  ;;  %v4376_v54 = vadd.f32 1.0, %v3068_v59  ;;  %vm1417_vm13 = vmor %vm1415_vm12, %vm1416_vm9  ;;  %vm1420_vm15 = vcmp.eq.f32.partialorder %v1419_v11, 8.507059e+37  ;;  %v2639_v18 = vmul.f32 -1.442695, %v4201_v47 }
 0x1c9   : > { %v929_v63 = vpop.f32.mrf.mxu2  ;;  %v1879_v41 = vpack.c.bf16 %v1847_v62, %v1845_v51  ;;  %v1333_v25 = vsel %vm1330_vm6, %v1332_v46, %v1328_v39  ;;  %v4378_v52 = vadd.f32 1.0, %v3070_v32  ;;  %v1412_v49 = vsub.f32 1.0, %v1411_v4 }
 0x1ca   : > { %v1786_v14 = vmul.f32 %v1333_v25, %v3960_v61  ;;  %3071 = vrcp.f32 %v4376_v54  ;;  %v1384_v28 = vadd.f32 %v4358_v31, %v1383_v20  ;;  %v1391_v51 = vand.u32 2147483648, %v4344_v57 }
 0x1cb   : > { %2052 = vmatmul.bf16.gmra.mxu0 %v1879_v41  ;;  %3073 = vrcp.f32 %v4378_v52  ;;  %v1413_v58 = vmul.f32 %v4363_v1, %v1412_v49  ;;  %vm1445_vm2 = vweird.f32 %v4376_v54  ;;  %vm1475_vm4 = vweird.f32 %v4378_v52 }
 0x1cc   : > { %v978_v53 = vpop.f32.mrf.mxu3  ;;  %3075 = vpow2.f32 %v2633_v3  ;;  %v1388_v55 = vsel %vm1387_vm11, %v4358_v31, %v1384_v28 }
 0x1cd   : > { %v4351_v35 = vadd.f32 %v978_v53, %v929_v63  ;;  %3077 = vpow2.f32 %v2635_v34  ;;  %v1414_v62 = vadd.f32 %v4363_v1, %v1413_v58  ;;  %v1389_v53 = vand.u32 2147483647, %v4344_v57 }
 0x1ce   : > { %v1449_v34 = vand.u32 2147483647, %v4376_v54  ;;  %v1479_v58 = vand.u32 2147483647, %v4378_v52 }
 0x1cf   : > { %v1418_v38 = vsel %vm1417_vm13, %v4363_v1, %v1414_v62  ;;  %vm1390_vm14 = vcmp.eq.f32.partialorder %v1389_v53, 8.507059e+37  ;;  %v2637_v1 = vmul.f32 -1.442695, %v4188_v9 }
 0x1d0   : > { %v4390_v43 = vpop.eup %3071  ;;  %v1423_v26 = vsel %vm1420_vm15, %v1422_v6, %v1418_v38  ;;  %vm1450_vm6 = vcmp.eq.f32.partialorder %v1449_v34, 8.507059e+37  ;;  %vm1480_vm7 = vcmp.eq.f32.partialorder %v1479_v58, 8.507059e+37  ;;  %v2643_v38 = vmul.f32 -1.442695, %v4252_v19 }
 0x1d1   : > { %v1088_v17 = vpop.f32.mrf.mxu2  ;;  %v4395_v50 = vpop.eup %3073  ;;  %v1441_v48 = vmul.f32 %v4390_v43, %v4376_v54  ;;  %v1792_v4 = vmul.f32 %v1423_v26, %v4039_v33  ;;  %vm1446_vm0 = vweird.f32 %v4390_v43 }
 0x1d2   : > { %v3076_v0 = vpop.eup %3075  ;;  %v1471_v57 = vmul.f32 %v4395_v50, %v4378_v52  ;;  %vm1476_vm1 = vweird.f32 %v4395_v50  ;;  %vm1447_vm3 = vmor %vm1445_vm2, %vm1446_vm0 }
 0x1d3   : > { %v3078_v27 = vpop.eup %3077  ;;  %v4408_v10 = vadd.f32 1.0, %v3076_v0  ;;  %v1442_v59 = vsub.f32 1.0, %v1441_v48  ;;  %vm1477_vm5 = vmor %vm1475_vm4, %vm1476_vm1 }
 0x1d4   : > { %v1137_v24 = vpop.f32.mrf.mxu3  ;;  %v4410_v31 = vadd.f32 1.0, %v3078_v27  ;;  %v1472_v39 = vsub.f32 1.0, %v1471_v57 }
 0x1d5   : > { %v1138_v45 = vadd.f32 %v1137_v24, %v1088_v17  ;;  %v1392_v17 = vor.u32 1.1754944e-38, %v1391_v51  ;;  %3079 = vrcp.f32 %v4408_v10  ;;  %v1443_v40 = vmul.f32 %v4390_v43, %v1442_v59 }
 0x1d6   : > { %3081 = vrcp.f32 %v4410_v31  ;;  %v1473_v8 = vmul.f32 %v4395_v50, %v1472_v39  ;;  %vm1505_vm10 = vweird.f32 %v4408_v10  ;;  %vm1535_vm12 = vweird.f32 %v4410_v31 }
 0x1d7   : > { %v1818_v36 = vmul.f32 %v1786_v14, %v1138_v45  ;;  %v1393_v24 = vsel %vm1390_vm14, %v1392_v17, %v1388_v55  ;;  %3083 = vpow2.f32 %v2637_v1  ;;  %v1451_v14 = vand.u32 2147483648, %v4376_v54 }
 0x1d8   : > { %v1790_v46 = vmul.f32 %v1393_v24, %v4022_v13  ;;  %3085 = vpow2.f32 %v2639_v18  ;;  %v1474_v3 = vadd.f32 %v4395_v50, %v1473_v8 }
 0x1d9   : > { %v1090_v23 = vpop.f32.mrf.mxu2  ;;  %v1452_v51 = vor.u32 1.1754944e-38, %v1451_v14 }
 0x1da   : > { %v1478_v62 = vsel %vm1477_vm5, %v4395_v50, %v1474_v3  ;;  %v2641_v50 = vmul.f32 -1.442695, %v4239_v42 }
 0x1db   : > { %v4422_v33 = vpop.eup %3079 }
 0x1dc   : > { %v1139_v7 = vpop.f32.mrf.mxu3  ;;  %vm1506_vm8 = vweird.f32 %v4422_v33 }
 0x1dd   : > { %v1140_v15 = vadd.f32 %v1139_v7, %v1090_v23  ;;  %v1444_v23 = vadd.f32 %v4390_v43, %v1443_v40  ;;  %vm1507_vm11 = vmor %vm1505_vm10, %vm1506_vm8 }
 0x1df   : > { %v1820_v44 = vmul.f32 %v1788_v12, %v1140_v15  ;;  %v4427_v12 = vpop.eup %3081  ;;  %v1481_v15 = vand.u32 2147483648, %v4378_v52 }
 0x1e0   : > { %v1531_v54 = vmul.f32 %v4427_v12, %v4410_v31  ;;  %vm1536_vm9 = vweird.f32 %v4427_v12 }
 0x1e1   : > { %v1866_v61 = vpack.c.bf16 %v1820_v44, %v1818_v36  ;;  %v1093_v63 = vpop.f32.mrf.mxu2  ;;  %v3084_v36 = vpop.eup %3083  ;;  %v1448_v44 = vsel %vm1447_vm3, %v4390_v43, %v1444_v23  ;;  %vm1537_vm13 = vmor %vm1535_vm12, %vm1536_vm9 }
 0x1e2   : > { %v3086_v28 = vpop.eup %3085  ;;  %v1453_v53 = vsel %vm1450_vm6, %v1452_v51, %v1448_v44  ;;  %v4440_v56 = vadd.f32 1.0, %v3084_v36  ;;  %v1532_v11 = vsub.f32 1.0, %v1531_v54 }
 0x1e3   : > { %2066 = vmatmul.bf16.vlgmr.msra.gmra.mxu1 %v1866_v61  ;;  %v1501_v61 = vmul.f32 %v4422_v33, %v4408_v10  ;;  %v4442_v43 = vadd.f32 1.0, %v3086_v28  ;;  %v1794_v48 = vmul.f32 %v1453_v53, %v4080_v37  ;;  %v2647_v28 = vmul.f32 -1.442695, %v4302_v22 }
 0x1e4   : > { %v1142_v41 = vpop.f32.mrf.mxu3  ;;  %3087 = vrcp.f32 %v4440_v56  ;;  %v1533_v24 = vmul.f32 %v4427_v12, %v1532_v11  ;;  %vm1565_vm2 = vweird.f32 %v4440_v56 }
 0x1e5   : > { %v1143_v16 = vadd.f32 %v1142_v41, %v1093_v63  ;;  %v1482_v63 = vor.u32 1.1754944e-38, %v1481_v15  ;;  %v1502_v41 = vsub.f32 1.0, %v1501_v61  ;;  %3089 = vrcp.f32 %v4442_v43 }
 0x1e6   : > { %3091 = vpow2.f32 %v2641_v50  ;;  %v1601_v50 = vand.u32 2147483648, %v4442_v43  ;;  %vm1595_vm4 = vweird.f32 %v4442_v43 }
 0x1e7   : > { %v1822_v49 = vmul.f32 %v1790_v46, %v1143_v16  ;;  %v1483_v52 = vsel %vm1480_vm7, %v1482_v63, %v1478_v62  ;;  %v1503_v6 = vmul.f32 %v4422_v33, %v1502_v41  ;;  %3093 = vpow2.f32 %v2643_v38 }
 0x1e8   : > { %v1796_v17 = vmul.f32 %v1483_v52, %v4097_v21  ;;  %v1511_v16 = vand.u32 2147483648, %v4408_v10  ;;  %v1571_v41 = vand.u32 2147483648, %v4440_v56 }
 0x1e9   : > { %v1095_v32 = vpop.f32.mrf.mxu2  ;;  %v1504_v39 = vadd.f32 %v4422_v33, %v1503_v6 }
 0x1ea   : > { %v4454_v21 = vpop.eup %3087 }
 0x1eb   : > { %v4459_v1 = vpop.eup %3089  ;;  %v1508_v8 = vsel %vm1507_vm11, %v4422_v33, %v1504_v39  ;;  %vm1566_vm0 = vweird.f32 %v4454_v21 }
 0x1ec   : > { %v1144_v29 = vpop.f32.mrf.mxu3  ;;  %v3092_v40 = vpop.eup %3091  ;;  %vm1596_vm1 = vweird.f32 %v4459_v1  ;;  %vm1567_vm3 = vmor %vm1565_vm2, %vm1566_vm0 }
 0x1ed   : > { %v1145_v25 = vadd.f32 %v1144_v29, %v1095_v32  ;;  %v1534_v32 = vadd.f32 %v4427_v12, %v1533_v24  ;;  %v1509_v29 = vand.u32 2147483647, %v4408_v10  ;;  %v1591_v10 = vmul.f32 %v4459_v1, %v4442_v43  ;;  %vm1597_vm5 = vmor %vm1595_vm4, %vm1596_vm1 }
 0x1ee   : > { %v1572_v24 = vor.u32 1.1754944e-38, %v1571_v41 }
 0x1ef   : > { %v1824_v45 = vmul.f32 %v1792_v4, %v1145_v25  ;;  %v1541_v4 = vand.u32 2147483648, %v4410_v31  ;;  %v1539_v25 = vand.u32 2147483647, %v4410_v31  ;;  %v1538_v23 = vsel %vm1537_vm13, %v4427_v12, %v1534_v32 }
 0x1f0   : > { %vm1510_vm14 = vcmp.eq.f32.partialorder %v1509_v29, 8.507059e+37  ;;  %v1592_v15 = vsub.f32 1.0, %v1591_v10  ;;  %v2645_v12 = vmul.f32 -1.442695, %v4288_v60 }
 0x1f1   : > { %v1868_v13 = vpack.c.bf16 %v1824_v45, %v1822_v49  ;;  %v1098_v7 = vpop.f32.mrf.mxu2  ;;  %v1561_v49 = vmul.f32 %v4454_v21, %v4440_v56  ;;  %v3094_v45 = vpop.eup %3093  ;;  %v1542_v14 = vor.u32 1.1754944e-38, %v1541_v4  ;;  %vm1540_vm15 = vcmp.eq.f32.partialorder %v1539_v25, 8.507059e+37 }
 0x1f2   : > { %v4474_v33 = vadd.f32 1.0, %v3094_v45  ;;  %v1593_v54 = vmul.f32 %v4459_v1, %v1592_v15 }
 0x1f3   : > { %2071 = vmatmul.bf16.gmra.mxu1 %v1868_v13  ;;  %v1512_v13 = vor.u32 1.1754944e-38, %v1511_v16  ;;  %v1543_v31 = vsel %vm1540_vm15, %v1542_v14, %v1538_v23  ;;  %v1562_v34 = vsub.f32 1.0, %v1561_v49 }
 0x1f4   : > { %v1147_v20 = vpop.f32.mrf.mxu3  ;;  %v1800_v61 = vmul.f32 %v1543_v31, %v4150_v5  ;;  %v1594_v11 = vadd.f32 %v4459_v1, %v1593_v54  ;;  %vm1655_vm12 = vweird.f32 %v4474_v33 }
 0x1f5   : > { %v1148_v0 = vadd.f32 %v1147_v20, %v1098_v7  ;;  %v1513_v3 = vsel %vm1510_vm14, %v1512_v13, %v1508_v8  ;;  %v4472_v7 = vadd.f32 1.0, %v3092_v40  ;;  %v1563_v62 = vmul.f32 %v4454_v21, %v1562_v34 }
 0x1f6   : > { %v1798_v36 = vmul.f32 %v1513_v3, %v4137_v30  ;;  %v2651_v8 = vmul.f32 -1.442695, %v4351_v35 }
 0x1f7   : > { %v1826_v26 = vmul.f32 %v1794_v48, %v1148_v0  ;;  %3095 = vrcp.f32 %v4472_v7  ;;  %v1564_v52 = vadd.f32 %v4454_v21, %v1563_v62  ;;  %v1569_v48 = vand.u32 2147483647, %v4440_v56 }
 0x1f8   : > { %3097 = vrcp.f32 %v4474_v33  ;;  %vm1625_vm10 = vweird.f32 %v4472_v7  ;;  %v1631_v15 = vand.u32 2147483648, %v4472_v7 }
 0x1f9   : > { %v1100_v55 = vpop.f32.mrf.mxu2  ;;  %3099 = vpow2.f32 %v2645_v12  ;;  %vm1570_vm6 = vcmp.eq.f32.partialorder %v1569_v48, 8.507059e+37  ;;  %v1629_v12 = vand.u32 2147483647, %v4472_v7 }
 0x1fa   : > { %3101 = vpow2.f32 %v2647_v28 }
 0x1fb   : > { %vm1630_vm14 = vcmp.eq.f32.partialorder %v1629_v12, 8.507059e+37 }
 0x1fc   : > { %v1149_v27 = vpop.f32.mrf.mxu3 }
 0x1fd   : > { %v1150_v57 = vadd.f32 %v1149_v27, %v1100_v55  ;;  %v4486_v5 = vpop.eup %3095 }
 0x1fe   : > { %v4491_v55 = vpop.eup %3097  ;;  %vm1626_vm8 = vweird.f32 %v4486_v5 }
 0x1ff   : > { %v1828_v59 = vmul.f32 %v1796_v17, %v1150_v57  ;;  %v1599_v17 = vand.u32 2147483647, %v4442_v43  ;;  %v3100_v38 = vpop.eup %3099  ;;  %v1568_v57 = vsel %vm1567_vm3, %v4454_v21, %v1564_v52  ;;  %v1651_v56 = vmul.f32 %v4491_v55, %v4474_v33  ;;  %vm4527_vm11 = vmor %vm1625_vm10, %vm1626_vm8 }
 0x200   : > { %v3102_v6 = vpop.eup %3101  ;;  %v1573_v39 = vsel %vm1570_vm6, %v1572_v24, %v1568_v57  ;;  %v4504_v16 = vadd.f32 1.0, %v3100_v38  ;;  %vm1656_vm9 = vweird.f32 %v4491_v55 }
 0x201   : > { %v1870_v37 = vpack.c.bf16 %v1828_v59, %v1826_v26  ;;  %v1103_v46 = vpop.f32.mrf.mxu2  ;;  %v1598_v26 = vsel %vm1597_vm5, %v4459_v1, %v1594_v11  ;;  %v1621_v59 = vmul.f32 %v4486_v5, %v4472_v7  ;;  %vm1600_vm7 = vcmp.eq.f32.partialorder %v1599_v17, 8.507059e+37  ;;  %vm1657_vm13 = vmor %vm1655_vm12, %vm1656_vm9 }
 0x202   : > { %v4506_v32 = vadd.f32 1.0, %v3102_v6  ;;  %v1802_v1 = vmul.f32 %v1573_v39, %v4188_v9  ;;  %3103 = vrcp.f32 %v4504_v16  ;;  %v1632_v7 = vor.u32 1.1754944e-38, %v1631_v15 }
 0x203   : > { %2076 = vmatmul.bf16.gmra.mxu1 %v1870_v37  ;;  %v1602_v37 = vor.u32 1.1754944e-38, %v1601_v50  ;;  %v1622_v21 = vsub.f32 1.0, %v1621_v59  ;;  %vm1685_vm2 = vweird.f32 %v4504_v16  ;;  %v1691_v39 = vand.u32 2147483648, %v4504_v16 }
 0x204   : > { %v1152_v18 = vpop.f32.mrf.mxu3  ;;  %3105 = vrcp.f32 %v4506_v32  ;;  %vm1715_vm4 = vweird.f32 %v4506_v32 }
 0x205   : > { %v1153_v20 = vadd.f32 %v1152_v18, %v1103_v46  ;;  %v1603_v43 = vsel %vm1600_vm7, %v1602_v37, %v1598_v26  ;;  %v1652_v46 = vsub.f32 1.0, %v1651_v56  ;;  %v2649_v18 = vmul.f32 -1.442695, %v4335_v2 }
 0x206   : > { %v1804_v40 = vmul.f32 %v1603_v43, %v4201_v47  ;;  %v1623_v45 = vmul.f32 %v4486_v5, %v1622_v21  ;;  %v1721_v43 = vand.u32 2147483648, %v4506_v32 }
 0x207   : > { %v1830_v63 = vmul.f32 %v1798_v36, %v1153_v20  ;;  %v1653_v13 = vmul.f32 %v4491_v55, %v1652_v46  ;;  %3107 = vpow2.f32 %v2649_v18  ;;  %v1661_v20 = vand.u32 2147483648, %v4474_v33 }
 0x208   : > { %3109 = vpow2.f32 %v2651_v8  ;;  %v4517_v14 = vpop.eup %3103  ;;  %v1624_v47 = vadd.f32 %v4486_v5, %v1623_v45  ;;  %v1689_v46 = vand.u32 2147483647, %v4504_v16  ;;  %v1722_v8 = vor.u32 1.1754944e-38, %v1721_v43 }
 0x209   : > { %v1105_v58 = vpop.f32.mrf.mxu2  ;;  %v1654_v3 = vadd.f32 %v4491_v55, %v1653_v13  ;;  %v1681_v54 = vmul.f32 %v4517_v14, %v4504_v16  ;;  %vm1686_vm0 = vweird.f32 %v4517_v14 }
 0x20a   : > { %v4522_v34 = vpop.eup %3105  ;;  %vm1687_vm3 = vmor %vm1685_vm2, %vm1686_vm0  ;;  %vm1690_vm6 = vcmp.eq.f32.partialorder %v1689_v46, 8.507059e+37  ;;  %v1852_v46 = vld [vmem:[%s3619_s3 + $0x18] sm:$0xff] }
 0x20b   : > { %v1658_v62 = vsel %vm1657_vm13, %v4491_v55, %v1654_v3  ;;  %v1682_v11 = vsub.f32 1.0, %v1681_v54  ;;  %vm1716_vm1 = vweird.f32 %v4522_v34 }
 0x20c   : > { %v1154_v44 = vpop.f32.mrf.mxu3  ;;  %vm1717_vm5 = vmor %vm1715_vm4, %vm1716_vm1 }
 0x20d   : > { %v1155_v51 = vadd.f32 %v1154_v44, %v1105_v58  ;;  %v1659_v44 = vand.u32 2147483647, %v4474_v33  ;;  %v1683_v38 = vmul.f32 %v4517_v14, %v1682_v11 }
 0x20f   : > { %v1832_v53 = vmul.f32 %v1800_v61, %v1155_v51  ;;  %v3108_v61 = vpop.eup %3107  ;;  %v1628_v51 = vsel %vm4527_vm11, %v4486_v5, %v1624_v47  ;;  %vm1660_vm15 = vcmp.eq.f32.partialorder %v1659_v44, 8.507059e+37 }
 0x210   : > { %v3110_v28 = vpop.eup %3109  ;;  %v4542_v33 = vadd.f32 1.0, %v3108_v61 }
 0x211   : > { %v1872_v30 = vpack.c.bf16 %v1832_v53, %v1830_v63  ;;  %v1108_v0 = vpop.f32.mrf.mxu2  ;;  %v1711_v63 = vmul.f32 %v4522_v34, %v4506_v32  ;;  %v1662_v53 = vor.u32 1.1754944e-38, %v1661_v20  ;;  %v4544_v41 = vadd.f32 1.0, %v3110_v28 }
 0x212   : > { %3111 = vrcp.f32 %v4542_v33  ;;  %vm1745_vm10 = vweird.f32 %v4542_v33  ;;  %v1749_v28 = vand.u32 2147483647, %v4542_v33 }
 0x213   : > { %2081 = vmatmul.bf16.gmra.mxu1 %v1872_v30  ;;  %v1633_v30 = vsel %vm1630_vm14, %v1632_v7, %v1628_v51  ;;  %v1663_v52 = vsel %vm1660_vm15, %v1662_v53, %v1658_v62  ;;  %v1712_v5 = vsub.f32 1.0, %v1711_v63  ;;  %3113 = vrcp.f32 %v4544_v41 }
 0x214   : > { %v1157_v27 = vpop.f32.mrf.mxu3  ;;  %v1806_v50 = vmul.f32 %v1633_v30, %v4239_v42  ;;  %v1684_v42 = vadd.f32 %v4517_v14, %v1683_v38  ;;  %vm1775_vm12 = vweird.f32 %v4544_v41  ;;  %v1779_v51 = vand.u32 2147483647, %v4544_v41 }
 0x215   : > { %v1158_v29 = vadd.f32 %v1157_v27, %v1108_v0  ;;  %v1808_v27 = vmul.f32 %v1663_v52, %v4252_v19  ;;  %v1713_v57 = vmul.f32 %v4522_v34, %v1712_v5  ;;  %vm1750_vm14 = vcmp.eq.f32.partialorder %v1749_v28, 8.507059e+37 }
 0x216   : > { %vm1780_vm15 = vcmp.eq.f32.partialorder %v1779_v51, 8.507059e+37 }
 0x217   : > { %v1834_v23 = vmul.f32 %v1802_v1, %v1158_v29  ;;  %v1714_v19 = vadd.f32 %v4522_v34, %v1713_v57  ;;  %v1719_v29 = vand.u32 2147483647, %v4506_v32  ;;  %v1849_v57 = vld [vmem:[%s3619_s3] sm:$0xff] }
 0x218   : > { %v4553_v59 = vpop.eup %3111 }
 0x219   : > { %v1110_v4 = vpop.f32.mrf.mxu2  ;;  %v3114_v37 = vpop.eup %3113  ;;  %v1718_v1 = vsel %vm1717_vm5, %v4522_v34, %v1714_v19  ;;  %v1741_v18 = vmul.f32 %v4553_v59, %v4542_v33  ;;  %vm1720_vm7 = vcmp.eq.f32.partialorder %v1719_v29, 8.507059e+37  ;;  %vm1746_vm8 = vweird.f32 %v4553_v59 }
 0x21a   : > { %v1723_v16 = vsel %vm1720_vm7, %v1722_v8, %v1718_v1  ;;  %vm1776_vm9 = vweird.f32 %v3114_v37  ;;  %vm1747_vm11 = vmor %vm1745_vm10, %vm1746_vm8 }
 0x21b   : > { %v1742_v45 = vsub.f32 1.0, %v1741_v18  ;;  %vm1777_vm13 = vmor %vm1775_vm12, %vm1776_vm9 }
 0x21c   : > { %v1159_v25 = vpop.f32.mrf.mxu3 }
 0x21d   : > { %v1160_v49 = vadd.f32 %v1159_v25, %v1110_v4  ;;  %v1688_v4 = vsel %vm1687_vm3, %v4517_v14, %v1684_v42  ;;  %v1771_v25 = vmul.f32 %v3114_v37, %v4544_v41  ;;  %v1812_v14 = vmul.f32 %v1723_v16, %v4302_v22 }
 0x21e   : > { %v1743_v3 = vmul.f32 %v4553_v59, %v1742_v45  ;;  %v1781_v22 = vand.u32 2147483648, %v4544_v41  ;;  %v1854_v45 = vld [vmem:[%s3619_s3 + $0x28] sm:$0xff] }
 0x21f   : > { %v1836_v10 = vmul.f32 %v1804_v40, %v1160_v49  ;;  %v1692_v40 = vor.u32 1.1754944e-38, %v1691_v39  ;;  %v1772_v13 = vsub.f32 1.0, %v1771_v25  ;;  %v1853_v25 = vld [vmem:[%s3619_s3 + $0x20] sm:$0xff] }
 0x220   : > { %v1744_v36 = vadd.f32 %v4553_v59, %v1743_v3  ;;  %v1782_v7 = vor.u32 1.1754944e-38, %v1781_v22 }
 0x221   : > { %v1874_v9 = vpack.c.bf16 %v1836_v10, %v1834_v23  ;;  %v1113_v31 = vpop.f32.mrf.mxu2  ;;  %v1693_v49 = vsel %vm1690_vm6, %v1692_v40, %v1688_v4 }
 0x222   : > { %v1748_v62 = vsel %vm1747_vm11, %v4553_v59, %v1744_v36  ;;  %v1850_v59 = vld [vmem:[%s3619_s3 + $0x8] sm:$0xff]  ;;  %v1857_v36 = vld [vmem:[%s3619_s3 + $0x40] sm:$0xff] }
 0x223   : > { %2086 = vmatmul.bf16.gmra.mxu1 %v1874_v9  ;;  %v1810_v9 = vmul.f32 %v1693_v49, %v4288_v60  ;;  %v1751_v60 = vand.u32 2147483648, %v4542_v33 }
 0x224   : > { %v1162_v58 = vpop.f32.mrf.mxu3 }
 0x225   : > { %v1163_v0 = vadd.f32 %v1162_v58, %v1113_v31  ;;  %v1773_v31 = vmul.f32 %v3114_v37, %v1772_v13  ;;  %v2018_v58 = vpop.f32.mrf.mxu0  ;;  %v1752_v63 = vor.u32 1.1754944e-38, %v1751_v60 }
 0x227   : > { %v1838_v6 = vmul.f32 %v1806_v50, %v1163_v0  ;;  %v1774_v12 = vadd.f32 %v3114_v37, %v1773_v31  ;;  %v1753_v53 = vsel %vm1750_vm14, %v1752_v63, %v1748_v62  ;;  %v1856_v31 = vld [vmem:[%s3619_s3 + $0x38] sm:$0xff]  ;;  %v1859_v63 = vld [vmem:[%s3619_s3 + $0x50] sm:$0xff] }
 0x228   : > { %v1814_v0 = vmul.f32 %v1753_v53, %v4335_v2 }
 0x229   : > { %v1115_v55 = vpop.f32.mrf.mxu2  ;;  %v1778_v54 = vsel %vm1777_vm13, %v3114_v37, %v1774_v12 }
 0x22a   : > { %v1783_v30 = vsel %vm1780_vm15, %v1782_v7, %v1778_v54 }
 0x22b   : > { %v1816_v41 = vmul.f32 %v1783_v30, %v4351_v35 }
 0x22c   : > { %v1164_v48 = vpop.f32.mrf.mxu3 }
 0x22d   : > { %v1165_v17 = vadd.f32 %v1164_v48, %v1115_v55  ;;  %v2020_v5 = vpop.f32.mrf.mxu0 }
 0x22f   : > { %v1840_v24 = vmul.f32 %v1808_v27, %v1165_v17 }
 0x231   : > { %v1876_v26 = vpack.c.bf16 %v1840_v24, %v1838_v6  ;;  %v1118_v56 = vpop.f32.mrf.mxu2 }
 0x233   : > { %2091 = vmatmul.bf16.gmra.mxu1 %v1876_v26 }
 0x234   : > { %v1167_v21 = vpop.f32.mrf.mxu3 }
 0x235   : > { %v1168_v23 = vadd.f32 %v1167_v21, %v1118_v56  ;;  %v2023_v17 = vpop.f32.mrf.mxu0  ;;  %v1851_v56 = vld [vmem:[%s3619_s3 + $0x10] sm:$0xff] }
 0x237   : > { %v1842_v34 = vmul.f32 %v1810_v9, %v1168_v23 }
 0x239   : > { %v1120_v32 = vpop.f32.mrf.mxu2 }
 0x23c   : > { %v1169_v10 = vpop.f32.mrf.mxu3 }
 0x23d   : > { %v1170_v47 = vadd.f32 %v1169_v10, %v1120_v32  ;;  %v2025_v38 = vpop.f32.mrf.mxu0  ;;  %v1855_v10 = vld [vmem:[%s3619_s3 + $0x30] sm:$0xff] }
 0x23f   : > { %v1844_v15 = vmul.f32 %v1812_v14, %v1170_v47 }
 0x241   : > { %v1878_v20 = vpack.c.bf16 %v1844_v15, %v1842_v34  ;;  %v1123_v44 = vpop.f32.mrf.mxu2 }
 0x243   : > { %2096 = vmatmul.bf16.gmra.mxu1 %v1878_v20 }
 0x244   : > { %v1172_v61 = vpop.f32.mrf.mxu3 }
 0x245   : > { %v1173_v52 = vadd.f32 %v1172_v61, %v1123_v44  ;;  %v2028_v42 = vpop.f32.mrf.mxu0  ;;  %v1858_v61 = vld [vmem:[%s3619_s3 + $0x48] sm:$0xff] }
 0x247   : > { %v1846_v48 = vmul.f32 %v1814_v0, %v1173_v52  ;;  %v1860_v52 = vld [vmem:[%s3619_s3 + $0x58] sm:$0xff] }
 0x249   : > { %v1125_v11 = vpop.f32.mrf.mxu2 }
 0x24c   : > { %v1174_v33 = vpop.f32.mrf.mxu3 }
 0x24d   : > { %v1175_v55 = vadd.f32 %v1174_v33, %v1125_v11  ;;  %v2030_v21 = vpop.f32.mrf.mxu0 }
 0x24f   : > { %v1848_v50 = vmul.f32 %v1816_v41, %v1175_v55  ;;  %v1861_v41 = vld [vmem:[%s3619_s3 + $0x60] sm:$0xff] }
 0x251   : > { %v1880_v27 = vpack.c.bf16 %v1848_v50, %v1846_v48 }
 0x253   : > { %2101 = vmatmul.bf16.gmra.mxu1 %v1880_v27 }
 0x255   : > { %v2033_v18 = vpop.f32.mrf.mxu0 }
 0x25d   : > { %v2035_v16 = vpop.f32.mrf.mxu0 }
 0x260   : > { %v2067_v6 = vpop.f32.mrf.mxu1 }
 0x261   : > { %v2068_v24 = vadd.f32 %v2067_v6, %v2018_v58 }
 0x263   : > { %v2107_v26 = vadd.f32 %v2068_v24, %v1849_v57 }
 0x265   : > { %2123 = vst [vmem:[%s3619_s3] sm:$0xff] %v2107_v26  ;;  %v2038_v47 = vpop.f32.mrf.mxu0  ;;  %v1863_v26 = vld [vmem:[%s3619_s3 + $0x70] sm:$0xff] }
 0x268   : > { %v2069_v2 = vpop.f32.mrf.mxu1 }
 0x269   : > { %v2070_v35 = vadd.f32 %v2069_v2, %v2020_v5 }
 0x26b   : > { %v2108_v19 = vadd.f32 %v2070_v35, %v1850_v59 }
 0x26d   : > { %2124 = vst [vmem:[%s3619_s3 + $0x8] sm:$0xff] %v2108_v19  ;;  %v2040_v58 = vpop.f32.mrf.mxu0  ;;  %v1864_v19 = vld [vmem:[%s3619_s3 + $0x78] sm:$0xff] }
 0x270   : > { %v2072_v37 = vpop.f32.mrf.mxu1 }
 0x271   : > { %v2073_v39 = vadd.f32 %v2072_v37, %v2023_v17  ;;  %v1862_v17 = vld [vmem:[%s3619_s3 + $0x68] sm:$0xff] }
 0x273   : > { %v2109_v43 = vadd.f32 %v2073_v39, %v1851_v56 }
 0x275   : > { %2125 = vst [vmem:[%s3619_s3 + $0x10] sm:$0xff] %v2109_v43  ;;  %v2043_v22 = vpop.f32.mrf.mxu0 }
 0x278   : > { %v2074_v29 = vpop.f32.mrf.mxu1 }
 0x279   : > { %v2075_v4 = vadd.f32 %v2074_v29, %v2025_v38 }
 0x27b   : > { %v2110_v1 = vadd.f32 %v2075_v4, %v1852_v46 }
 0x27d   : > { %2126 = vst [vmem:[%s3619_s3 + $0x18] sm:$0xff] %v2110_v1  ;;  %v2045_v54 = vpop.f32.mrf.mxu0 }
 0x280   : > { %v2077_v40 = vpop.f32.mrf.mxu1 }
 0x281   : > { %v2078_v8 = vadd.f32 %v2077_v40, %v2028_v42 }
 0x283   : > { %v2111_v49 = vadd.f32 %v2078_v8, %v1853_v25 }
 0x285   : > { %2127 = vst [vmem:[%s3619_s3 + $0x20] sm:$0xff] %v2111_v49  ;;  %v2048_v33 = vpop.f32.mrf.mxu0 }
 0x288   : > { %v2079_v13 = vpop.f32.mrf.mxu1 }
 0x289   : > { %v2080_v23 = vadd.f32 %v2079_v13, %v2030_v21 }
 0x28b   : > { %v2112_v32 = vadd.f32 %v2080_v23, %v1854_v45 }
 0x28d   : > { %2128 = vst [vmem:[%s3619_s3 + $0x28] sm:$0xff] %v2112_v32  ;;  %v2050_v27 = vpop.f32.mrf.mxu0 }
 0x290   : > { %v2082_v9 = vpop.f32.mrf.mxu1 }
 0x291   : > { %v2083_v14 = vadd.f32 %v2082_v9, %v2033_v18 }
 0x293   : > { %v2113_v3 = vadd.f32 %v2083_v14, %v1855_v10 }
 0x295   : > { %2129 = vst [vmem:[%s3619_s3 + $0x30] sm:$0xff] %v2113_v3  ;;  %v2053_v24 = vpop.f32.mrf.mxu0 }
 0x298   : > { %v2084_v34 = vpop.f32.mrf.mxu1 }
 0x299   : > { %v2085_v15 = vadd.f32 %v2084_v34, %v2035_v16 }
 0x29b   : > { %v2114_v20 = vadd.f32 %v2085_v15, %v1856_v31 }
 0x29d   : > { %2130 = vst [vmem:[%s3619_s3 + $0x38] sm:$0xff] %v2114_v20  ;;  %v2055_v42 = vpop.f32.mrf.mxu0 }
 0x2a0   : > { %v2087_v12 = vpop.f32.mrf.mxu1 }
 0x2a1   : > { %v2088_v44 = vadd.f32 %v2087_v12, %v2038_v47 }
 0x2a3   : > { %v2115_v60 = vadd.f32 %v2088_v44, %v1857_v36 }
 0x2a5   : > { %2131 = vst [vmem:[%s3619_s3 + $0x40] sm:$0xff] %v2115_v60 }
 0x2a8   : > { %v2089_v28 = vpop.f32.mrf.mxu1 }
 0x2a9   : > { %v2090_v51 = vadd.f32 %v2089_v28, %v2040_v58 }
 0x2ab   : > { %v2116_v62 = vadd.f32 %v2090_v51, %v1858_v61 }
 0x2ad   : > { %2132 = vst [vmem:[%s3619_s3 + $0x48] sm:$0xff] %v2116_v62 }
 0x2b0   : > { %v2092_v7 = vpop.f32.mrf.mxu1 }
 0x2b1   : > { %v2093_v53 = vadd.f32 %v2092_v7, %v2043_v22 }
 0x2b3   : > { %v2117_v30 = vadd.f32 %v2093_v53, %v1859_v63 }
 0x2b5   : > { %2133 = vst [vmem:[%s3619_s3 + $0x50] sm:$0xff] %v2117_v30 }
 0x2b8   : > { %v2094_v11 = vpop.f32.mrf.mxu1 }
 0x2b9   : > { %v2095_v5 = vadd.f32 %v2094_v11, %v2045_v54 }
 0x2bb   : > { %v2118_v0 = vadd.f32 %v2095_v5, %v1860_v52 }
 0x2bd   : > { %2134 = vst [vmem:[%s3619_s3 + $0x58] sm:$0xff] %v2118_v0 }
 0x2c0   : > { %v2097_v55 = vpop.f32.mrf.mxu1 }
 0x2c1   : > { %v2098_v48 = vadd.f32 %v2097_v55, %v2048_v33 }
 0x2c3   : > { %v2119_v50 = vadd.f32 %v2098_v48, %v1861_v41 }
 0x2c5   : > { %2135 = vst [vmem:[%s3619_s3 + $0x60] sm:$0xff] %v2119_v50 }
 0x2c8   : > { %v2099_v38 = vpop.f32.mrf.mxu1 }
 0x2c9   : > { %v2100_v57 = vadd.f32 %v2099_v38, %v2050_v27 }
 0x2cb   : > { %v2120_v6 = vadd.f32 %v2100_v57, %v1862_v17 }
 0x2cd   : > { %2136 = vst [vmem:[%s3619_s3 + $0x68] sm:$0xff] %v2120_v6 }
 0x2d0   : > { %v2102_v59 = vpop.f32.mrf.mxu1 }
 0x2d1   : > { %v2103_v2 = vadd.f32 %v2102_v59, %v2053_v24 }
 0x2d3   : > { %v2121_v35 = vadd.f32 %v2103_v2, %v1863_v26 }
 0x2d5   : > { %2137 = vst [vmem:[%s3619_s3 + $0x70] sm:$0xff] %v2121_v35 }
 0x2d8   : > { %v2104_v56 = vpop.f32.mrf.mxu1 }
 0x2d9   : > { %v2105_v37 = vadd.f32 %v2104_v56, %v2055_v42 }
 0x2db   : > { %v2122_v39 = vadd.f32 %v2105_v37, %v1864_v19 }
 0x2dd   : > { %2138 = vst [vmem:[%s3619_s3 + $0x78] sm:$0xff] %v2122_v39 }
 0x2de   : > { %3232 = shalt.err (!%p3229_p3)
}
 0x2df   : > { %s3370_s15 = smov 128   ;;  %s3371_s3 = smov 256  }
 0x2e0   : > { %s3372_s4 = smov 8  }
 0x2e1   : > { %2842 = dma.vmem_to_hbm [thread:$0]  (%p3534_p6), %s2155_s1, 2048, %s2157_s13, %s2140_s20, %s3370_s15, %s3371_s3, %s3372_s4  }
 0x2e2 PF: > { %s4766_s22 = sld [smem:[#allocation13_spill]]  ;;  %p2862_p9 = scmp.ge.s32.totalorder %s3359_s25, 2 }
 0x2e4   : > { %p2856_p0 = pnand %p2862_p9, %p3539_p7 }
 0x2e6   : > { %p2857_p13 = pneg %p2856_p0 }
 0x2e8   : > { %s2171_s9 = sand.u32 1, %s4766_s22  }
 0x2e9   : > { %s2172_s26 = scalar_lea.sflag [#allocation4], %s2171_s9 }
 0x2ea   : > { %3302 = dma.done.wait (%p2857_p13), %s2172_s26, 2048  }
 0x2eb   : > { %3304 = vsyncadd (%p2857_p13), %s2172_s26, 4294965248  ;;  %s20_s25 = sadd.s32 1, %s3359_s25   ;;  %s4769_s30 = sld [smem:[#allocation14_spill]] }
 0x2ec   : > { %p4637_p2 = scmp.ge.s32.totalorder %s20_s25, 6   ;;  %s4770_s11 = smov %s3584_s12 }
 0x2ed   : > { %s4771_s1 = sld [smem:[#allocation15_spill]]  ;;  %s4776_s13 = smov %s3315_s14 }
 0x2ee   : > { %s4772_s20 = sld [smem:[#allocation20_spill]]  ;;  %s4777_s14 = smov %s3581_s18 }
 0x2ef   : > { %s4773_s21 = sld [smem:[#allocation18_spill]]  ;;  %s4778_s15 = smov %s3323_s16 }
 0x2f0   : > { %s4774_s23 = sld [smem:[#allocation19_spill]]  ;;  %s4779_s16 = smov %s3327_s17 }
 0x2f1   : > { %s4775_s12 = smov %s4769_s30  ;;  %s4780_s17 = smov %s4770_s11 }
 0x2f2   : > { %s4781_s18 = smov %s3335_s19  ;;  %s4783_s22 = smov %s3355_s24 }
 0x2f3   : > { %s4782_s19 = smov %s4771_s1  ;;  %s4784_s24 = smov %s4790_s10 }
 0x2f4   :  { %19 = sbr.rel (!%p4637_p2) target bundleno = 15 (0xf), region = 98 }
 0x2f9   :  { %2178 = vsyncpa [#allocation3], 1 }
 0x2fa   :  { %2180 = vsyncpa [#allocation3 + $0x1], 1 }
 0x2fb   :  { %2181 = vsyncpa [#allocation6], 1 }
 0x2fc   :  { %2183 = vsyncpa [#allocation6 + $0x1], 1 }
 0x2fd   :  { %2184 = vsyncpa [#allocation4], 1 }
 0x2fe   :  { %2186 = vsyncpa [#allocation4 + $0x1], 1 }

</bundles_post_ra>
